<compile_context>
chip_gen: v7x
topology: tpu7x:2x2x1
jax: 0.10.0
libtpu: 0.0.40
codegen_flags: <defaults>
</compile_context>

<pallas_src>
from functools import partial

import numpy as np
import jax
import jax.numpy as jnp
from jax.experimental import pallas as pl
from jax.experimental.pallas import tpu as pltpu


def _round_up(x, m):
    return ((x + m - 1) // m) * m


# ----------------------------------------------------------------------------
# Fused kernel: LayerNorm (affine folded) -> Linear+ReLU -> Linear+ReLU -> Linear
# ----------------------------------------------------------------------------

def _plddt_head_kernel(x_ref, w0_ref, b0_ref, w1_ref, b1_ref, w2_ref, b2_ref, o_ref):
    # x: (TR, C) row tile in its native dtype; weights/biases are full & VMEM-resident.
    x = x_ref[...].astype(jnp.float32)

    # LayerNorm over the channel (lane) axis; eps matches nn.LayerNorm default.
    # gamma/beta are folded into w0/b0 at init time; rsqrt goes to the EUP slot.
    mean = jnp.mean(x, axis=-1, keepdims=True)
    xc = x - mean
    var = jnp.mean(xc * xc, axis=-1, keepdims=True)
    norm = xc * jax.lax.rsqrt(var + 1e-5)

    # Three MXU matmuls with f32 accumulation; ReLU on the VPU.
    act = jnp.dot(norm, w0_ref[...], preferred_element_type=jnp.float32) + b0_ref[...]
    act = jnp.maximum(act, 0.0)
    act = jnp.dot(act, w1_ref[...], preferred_element_type=jnp.float32) + b1_ref[...]
    act = jnp.maximum(act, 0.0)
    out = jnp.dot(act, w2_ref[...], preferred_element_type=jnp.float32) + b2_ref[...]

    o_ref[...] = out.astype(o_ref.dtype)


@partial(jax.jit, static_argnames=("num_bins", "row_tile"))
def predicted_lddt_forward(x, kparams, *, num_bins, row_tile=1024):
    """x: (..., seq_channel) -> logits (..., num_bins) in x.dtype, single fused pass."""
    w0, b0 = kparams['w0f'], kparams['b0f']      # (C, H), (1, H)   LN affine folded in
    w1, b1 = kparams['w1'], kparams['b1']        # (H, H), (1, H)
    w2, b2 = kparams['w2p'], kparams['b2p']      # (H, NBp), (1, NBp)  lane-padded

    C = x.shape[-1]
    H = w0.shape[1]
    nb_p = w2.shape[1]

    lead = x.shape[:-1]
    rows = int(np.prod(lead)) if lead else 1
    x2 = x.reshape(rows, C)                      # no dtype cast, no row padding

    # Row tile: large (amortize per-step overhead), multiple of 8, but capped at
    # ceil(rows/2) so the "parallel" grid keeps >= 2 steps (v7x megacore sharding).
    half = _round_up(max(1, -(-rows // 2)), 8)
    tr = max(8, min(_round_up(row_tile, 8), half))
    grid = (pl.cdiv(rows, tr),)

    rep = lambda i: (0, 0)   # weights: same full block every step -> stay VMEM-resident
    # TODO(synk): pipeline_mode=pl.Buffered(1) on the resident weight specs would save
    # their second buffer (~0.4 MiB); skipped here since it is negligible at this size.

    out_p = pl.pallas_call(
        _plddt_head_kernel,
        out_shape=jax.ShapeDtypeStruct((rows, nb_p), x.dtype),
        grid=grid,
        in_specs=[
            pl.BlockSpec((tr, C), lambda i: (i, 0)),   # streamed activation rows
            pl.BlockSpec((C, H), rep),                 # act_0 weight (gamma folded)
            pl.BlockSpec((1, H), rep),                 # act_0 bias (beta folded)
            pl.BlockSpec((H, H), rep),                 # act_1 weight
            pl.BlockSpec((1, H), rep),                 # act_1 bias
            pl.BlockSpec((H, nb_p), rep),              # logits weight (lane-padded)
            pl.BlockSpec((1, nb_p), rep),              # logits bias (lane-padded)
        ],
        out_specs=pl.BlockSpec((tr, nb_p), lambda i: (i, 0)),
        compiler_params=pltpu.CompilerParams(
            dimension_semantics=("parallel",)),        # megacore on v7x, pipelined elsewhere
    )(x2, w0, b0, w1, b1, w2, b2)

    # Lane-pad slice + reshape fuse into the consumer under jit.
    return out_p[:, :num_bins].reshape(*lead, num_bins)


# ----------------------------------------------------------------------------
# Module wrapper (mirrors the PyTorch PredictedLddt)
# ----------------------------------------------------------------------------

class PredictedLddt:
    """JAX/Pallas port of PredictedLddt.

    Linear weights are stored as (in_features, out_features) -- the transpose of the
    torch.nn.Linear layout -- so the kernel computes x @ W + b directly.
    """

    def __init__(self, global_config, key=jax.random.PRNGKey(0)):
        c = global_config['model']['embeddings_and_evoformer']['seq_channel']
        h = global_config['model']['heads']['predicted_lddt']['num_channels']
        nb = global_config['model']['heads']['predicted_lddt']['num_bins']
        k0, k1, k2, k3, k4, k5 = jax.random.split(key, 6)

        def lin(kw, kb, fan_in, fan_out):
            bound = 1.0 / np.sqrt(fan_in)          # torch.nn.Linear default init
            w = jax.random.uniform(kw, (fan_in, fan_out), jnp.float32, -bound, bound)
            b = jax.random.uniform(kb, (fan_out,), jnp.float32, -bound, bound)
            return w, b

        w0, b0 = lin(k0, k1, c, h)
        w1, b1 = lin(k2, k3, h, h)
        w2, b2 = lin(k4, k5, h, nb)
        gamma = jnp.ones((c,), jnp.float32)
        beta = jnp.zeros((c,), jnp.float32)

        # Raw parameters (reference / checkpoint-compatible layout).
        self.params = {
            'ln_gamma': gamma, 'ln_beta': beta,
            'w0': w0, 'b0': b0, 'w1': w1, 'b1': b1, 'w2': w2, 'b2': b2,
        }
        self.num_bins = int(nb)

        # Kernel-ready parameters, prepared ONCE (no per-call HBM passes):
        #   * LayerNorm affine folded into the first Linear: w0' = diag(gamma) @ w0,
        #     b0' = beta @ w0 + b0,
        #   * logits weight/bias padded to a lane-dense multiple of 128,
        #   * biases reshaped to (1, N) rows.
        # TODO(synk): optionally store weights in bf16 (halves the one-time weight DMA,
        # mainly relevant on v5e); kept f32 here for tight parity with the reference.
        nb_p = _round_up(nb, 128)
        self.kernel_params = {
            'w0f': gamma[:, None] * w0,
            'b0f': (beta @ w0 + b0).reshape(1, h),
            'w1': w1,
            'b1': b1.reshape(1, h),
            'w2p': jnp.pad(w2, ((0, 0), (0, nb_p - nb))),
            'b2p': jnp.pad(b2, ((0, nb_p - nb),)).reshape(1, nb_p),
        }

    def __call__(self, representations):
        return predicted_lddt_forward(representations['structure_module'],
                                      self.kernel_params, num_bins=self.num_bins)


def _reference_forward(x, params):
    """Pure-JAX reference (matches the PyTorch forward) for validation."""
    x = x.astype(jnp.float32)
    mean = jnp.mean(x, axis=-1, keepdims=True)
    var = jnp.mean((x - mean) ** 2, axis=-1, keepdims=True)
    act = (x - mean) / jnp.sqrt(var + 1e-5) * params['ln_gamma'] + params['ln_beta']
    act = jax.nn.relu(act @ params['w0'] + params['b0'])
    act = jax.nn.relu(act @ params['w1'] + params['b1'])
    return act @ params['w2'] + params['b2']


# ----------------------------------------------------------------------------
# Demo
# ----------------------------------------------------------------------------

if __name__ == "__main__":
    cfg = {
        'model': {
            'embeddings_and_evoformer': {'seq_channel': 128},
            'heads': {'predicted_lddt': {'num_channels': 128, 'num_bins': 50}},
        },
    }

    key = jax.random.PRNGKey(0)
    k_param, k_x = jax.random.split(key)
    head = PredictedLddt(cfg, key=k_param)

    B, n_res = 2, 256
    C = cfg['model']['embeddings_and_evoformer']['seq_channel']
    NB = cfg['model']['heads']['predicted_lddt']['num_bins']
    x = jax.random.normal(k_x, (B, n_res, C), jnp.float32)

    # f32 streaming path
    logits = head({'structure_module': x})
    jax.block_until_ready(logits)
    assert logits.shape == (B, n_res, NB), logits.shape
    ref = _reference_forward(x, head.params)
    max_err = float(jnp.max(jnp.abs(logits - ref)))
    assert max_err < 2e-3, f"f32 max abs err vs reference: {max_err}"

    # bf16 streaming path (halves HBM traffic on the bandwidth-bound kernel)
    x_bf16 = x.astype(jnp.bfloat16)
    logits_bf16 = head({'structure_module': x_bf16})
    jax.block_until_ready(logits_bf16)
    assert logits_bf16.dtype == jnp.bfloat16 and logits_bf16.shape == (B, n_res, NB)
    ref_bf16 = _reference_forward(x_bf16, head.params)
    err_bf16 = float(jnp.max(jnp.abs(logits_bf16.astype(jnp.float32) - ref_bf16)))
    assert err_bf16 < 1e-1, f"bf16 max abs err vs reference: {err_bf16}"

    print("KERNEL_OK")
</pallas_src>

<mosaic_0001>
module attributes {stable_mosaic.version = 11 : i64} {
  func.func @_plddt_head_kernel(%arg0: i32, %arg1: memref<256x128xf32, #tpu.memory_space<vmem>>, %arg2: memref<128x128xf32, #tpu.memory_space<vmem>>, %arg3: memref<1x128xf32, #tpu.memory_space<vmem>>, %arg4: memref<128x128xf32, #tpu.memory_space<vmem>>, %arg5: memref<1x128xf32, #tpu.memory_space<vmem>>, %arg6: memref<128x128xf32, #tpu.memory_space<vmem>>, %arg7: memref<1x128xf32, #tpu.memory_space<vmem>>, %arg8: memref<256x128xf32, #tpu.memory_space<vmem>>) attributes {dimension_semantics = [#tpu.dimension_semantics<parallel>], iteration_bounds = array<i64: 2>, scalar_prefetch = 0 : i64, scratch_operands = 0 : i64, tpu.core_type = #tpu.core_type<tc>, window_params = [{transform_indices = @transform_0, window_bounds = array<i64: 256, 128>}, {pipeline_mode = #tpu.pipeline_mode<synchronous>, transform_indices = @transform_1, window_bounds = array<i64: 128, 128>}, {pipeline_mode = #tpu.pipeline_mode<synchronous>, transform_indices = @transform_2, window_bounds = array<i64: 1, 128>}, {pipeline_mode = #tpu.pipeline_mode<synchronous>, transform_indices = @transform_3, window_bounds = array<i64: 128, 128>}, {pipeline_mode = #tpu.pipeline_mode<synchronous>, transform_indices = @transform_4, window_bounds = array<i64: 1, 128>}, {pipeline_mode = #tpu.pipeline_mode<synchronous>, transform_indices = @transform_5, window_bounds = array<i64: 128, 128>}, {pipeline_mode = #tpu.pipeline_mode<synchronous>, transform_indices = @transform_6, window_bounds = array<i64: 1, 128>}, {transform_indices = @transform_7, window_bounds = array<i64: 256, 128>}]} {
    %c0 = arith.constant 0 : index
    %c0_0 = arith.constant 0 : index
    %0 = vector.load %arg1[%c0, %c0_0] : memref<256x128xf32, #tpu.memory_space<vmem>>, vector<256x128xf32>
    %cst = arith.constant dense<0.000000e+00> : vector<256xf32>
    %1 = vector.multi_reduction <add>, %0, %cst [1] : vector<256x128xf32> to vector<256xf32>
    %2 = vector.shape_cast %1 : vector<256xf32> to vector<256x1xf32>
    %cst_1 = arith.constant 1.280000e+02 : f32
    %3 = vector.broadcast %cst_1 : f32 to vector<256x1xf32>
    %4 = arith.divf %2, %3 : vector<256x1xf32>
    %5 = vector.broadcast %4 : vector<256x1xf32> to vector<256x128xf32>
    %6 = arith.subf %0, %5 : vector<256x128xf32>
    %7 = arith.mulf %6, %6 : vector<256x128xf32>
    %cst_2 = arith.constant dense<0.000000e+00> : vector<256xf32>
    %8 = vector.multi_reduction <add>, %7, %cst_2 [1] : vector<256x128xf32> to vector<256xf32>
    %9 = vector.shape_cast %8 : vector<256xf32> to vector<256x1xf32>
    %cst_3 = arith.constant 1.280000e+02 : f32
    %10 = vector.broadcast %cst_3 : f32 to vector<256x1xf32>
    %11 = arith.divf %9, %10 : vector<256x1xf32>
    %cst_4 = arith.constant 9.99999974E-6 : f32
    %12 = vector.broadcast %cst_4 : f32 to vector<256x1xf32>
    %13 = arith.addf %11, %12 : vector<256x1xf32>
    %14 = math.rsqrt %13 : vector<256x1xf32>
    %15 = vector.broadcast %14 : vector<256x1xf32> to vector<256x128xf32>
    %16 = arith.mulf %6, %15 : vector<256x128xf32>
    %c0_5 = arith.constant 0 : index
    %c0_6 = arith.constant 0 : index
    %17 = vector.load %arg2[%c0_5, %c0_6] : memref<128x128xf32, #tpu.memory_space<vmem>>, vector<128x128xf32>
    %cst_7 = arith.constant dense<0.000000e+00> : vector<256x128xf32>
    %18 = tpu.matmul %16, %17, %cst_7 {dimension_numbers = #tpu.dot_dimension_numbers<[1], [0], [0], [1], [0, 0, 1, 1], [], []>} : vector<256x128xf32>, vector<128x128xf32>, vector<256x128xf32> -> vector<256x128xf32>
    %c0_8 = arith.constant 0 : index
    %c0_9 = arith.constant 0 : index
    %19 = vector.load %arg3[%c0_8, %c0_9] : memref<1x128xf32, #tpu.memory_space<vmem>>, vector<1x128xf32>
    %20 = vector.broadcast %19 : vector<1x128xf32> to vector<256x128xf32>
    %21 = arith.addf %18, %20 : vector<256x128xf32>
    %cst_10 = arith.constant 0.000000e+00 : f32
    %22 = vector.broadcast %cst_10 : f32 to vector<256x128xf32>
    %23 = arith.maximumf %21, %22 : vector<256x128xf32>
    %c0_11 = arith.constant 0 : index
    %c0_12 = arith.constant 0 : index
    %24 = vector.load %arg4[%c0_11, %c0_12] : memref<128x128xf32, #tpu.memory_space<vmem>>, vector<128x128xf32>
    %cst_13 = arith.constant dense<0.000000e+00> : vector<256x128xf32>
    %25 = tpu.matmul %23, %24, %cst_13 {dimension_numbers = #tpu.dot_dimension_numbers<[1], [0], [0], [1], [0, 0, 1, 1], [], []>} : vector<256x128xf32>, vector<128x128xf32>, vector<256x128xf32> -> vector<256x128xf32>
    %c0_14 = arith.constant 0 : index
    %c0_15 = arith.constant 0 : index
    %26 = vector.load %arg5[%c0_14, %c0_15] : memref<1x128xf32, #tpu.memory_space<vmem>>, vector<1x128xf32>
    %27 = vector.broadcast %26 : vector<1x128xf32> to vector<256x128xf32>
    %28 = arith.addf %25, %27 : vector<256x128xf32>
    %cst_16 = arith.constant 0.000000e+00 : f32
    %29 = vector.broadcast %cst_16 : f32 to vector<256x128xf32>
    %30 = arith.maximumf %28, %29 : vector<256x128xf32>
    %c0_17 = arith.constant 0 : index
    %c0_18 = arith.constant 0 : index
    %31 = vector.load %arg6[%c0_17, %c0_18] : memref<128x128xf32, #tpu.memory_space<vmem>>, vector<128x128xf32>
    %cst_19 = arith.constant dense<0.000000e+00> : vector<256x128xf32>
    %32 = tpu.matmul %30, %31, %cst_19 {dimension_numbers = #tpu.dot_dimension_numbers<[1], [0], [0], [1], [0, 0, 1, 1], [], []>} : vector<256x128xf32>, vector<128x128xf32>, vector<256x128xf32> -> vector<256x128xf32>
    %c0_20 = arith.constant 0 : index
    %c0_21 = arith.constant 0 : index
    %33 = vector.load %arg7[%c0_20, %c0_21] : memref<1x128xf32, #tpu.memory_space<vmem>>, vector<1x128xf32>
    %34 = vector.broadcast %33 : vector<1x128xf32> to vector<256x128xf32>
    %35 = arith.addf %32, %34 : vector<256x128xf32>
    %c0_22 = arith.constant 0 : index
    %c0_23 = arith.constant 0 : index
    %36 = vector.load %arg8[%c0_22, %c0_23] : memref<256x128xf32, #tpu.memory_space<vmem>>, vector<256x128xf32>
    tpu.vector_store %arg8[%c0_22, %c0_23], %35 {strides = array<i32>} : memref<256x128xf32, #tpu.memory_space<vmem>>, vector<256x128xf32>,
    return
  }
  func.func @transform_0(%arg0: i32) -> (i32, i32) {
    %c0_i32 = arith.constant 0 : i32
    %c0_i32_0 = arith.constant 0 : i32
    return %arg0, %c0_i32 : i32, i32
  }
  func.func @transform_1(%arg0: i32) -> (i32, i32) {
    %c0_i32 = arith.constant 0 : i32
    %c0_i32_0 = arith.constant 0 : i32
    %c0_i32_1 = arith.constant 0 : i32
    return %c0_i32, %c0_i32_0 : i32, i32
  }
  func.func @transform_2(%arg0: i32) -> (i32, i32) {
    %c0_i32 = arith.constant 0 : i32
    %c0_i32_0 = arith.constant 0 : i32
    %c0_i32_1 = arith.constant 0 : i32
    return %c0_i32, %c0_i32_0 : i32, i32
  }
  func.func @transform_3(%arg0: i32) -> (i32, i32) {
    %c0_i32 = arith.constant 0 : i32
    %c0_i32_0 = arith.constant 0 : i32
    %c0_i32_1 = arith.constant 0 : i32
    return %c0_i32, %c0_i32_0 : i32, i32
  }
  func.func @transform_4(%arg0: i32) -> (i32, i32) {
    %c0_i32 = arith.constant 0 : i32
    %c0_i32_0 = arith.constant 0 : i32
    %c0_i32_1 = arith.constant 0 : i32
    return %c0_i32, %c0_i32_0 : i32, i32
  }
  func.func @transform_5(%arg0: i32) -> (i32, i32) {
    %c0_i32 = arith.constant 0 : i32
    %c0_i32_0 = arith.constant 0 : i32
    %c0_i32_1 = arith.constant 0 : i32
    return %c0_i32, %c0_i32_0 : i32, i32
  }
  func.func @transform_6(%arg0: i32) -> (i32, i32) {
    %c0_i32 = arith.constant 0 : i32
    %c0_i32_0 = arith.constant 0 : i32
    %c0_i32_1 = arith.constant 0 : i32
    return %c0_i32, %c0_i32_0 : i32, i32
  }
  func.func @transform_7(%arg0: i32) -> (i32, i32) {
    %c0_i32 = arith.constant 0 : i32
    %c0_i32_0 = arith.constant 0 : i32
    return %arg0, %c0_i32 : i32, i32
  }
}

</mosaic_0001>

<bundles_post_ra>
// kernel: predicted_lddt_forward.1
= control target key start
LH: loop header
LB: loop body
LE: loop exit
PB: predicated region body
PF: predicated region fallthrough
CT: control target
= control target key end

     0   :  { %12 = vsyncpa [#allocation3], 0  ;;  %s3218_s0 = inlined_call_operand.hbm [shape: f32[512,128], index: 0, kind: input, shape index: {}]   ;;  %s3219_s1 = inlined_call_operand.hbm [shape: f32[128,128], index: 1, kind: input, shape index: {}]   ;;  %s3220_s2 = inlined_call_operand.vmem [shape: f32[1,128], index: 2, kind: input, shape index: {}]   ;;  %s3221_s3 = inlined_call_operand.hbm [shape: f32[128,128], index: 3, kind: input, shape index: {}]   ;;  %s3222_s4 = inlined_call_operand.vmem [shape: f32[1,128], index: 4, kind: input, shape index: {}]   ;;  %s3223_s5 = inlined_call_operand.hbm [shape: f32[128,128], index: 5, kind: input, shape index: {}]   ;;  %s3224_s6 = inlined_call_operand.vmem [shape: f32[1,128], index: 6, kind: input, shape index: {}]   ;;  %s3225_s7 = inlined_call_operand.vmem [shape: f32[512,128], index: 7, kind: output, shape index: {}]  }
   0x1   :  { %14 = vsyncpa [#allocation3 + $0x1], 0 }
   0x2   :  { %15 = vsyncpa [#allocation5], 0 }
   0x3   :  { %16 = vsyncpa [#allocation8], 0  ;;  %s2525_s24 = smov 0   ;;  %s2527_s25 = smov 0  }
   0x4   :  { %s2529_s26 = smov 0   ;;  %s2531_s27 = smov 0  }
   0x5 LB: > { %s1666_s28 = sadd.s32 4294967295, %s2477_s27   ;;  %p42_p0 = scmp.ne.s32.totalorder %s2469_s25, %s2465_s24  ;;  %s2477_s27 = sphi %s2531_s27, %s3242_s27   ;;  %s2473_s26 = sphi %s2529_s26, %s3241_s26   ;;  %s2469_s25 = sphi %s2527_s25, %s3240_s25   ;;  %s2465_s24 = sphi %s2525_s24, %s3239_s24  }
   0x6   : > { %p2547_p1 = scmp.eq.s32.totalorder %s1666_s28, 0  ;;  %p1668_p2 = scmp.ge.s32.totalorder %s2477_s27, 1 }
   0x7   : > { %p205_p3 = scmp.lt.s32.totalorder %s2477_s27, 3  ;;  %s2479_s9 = smov [#allocation4]  }
   0x8   : > { %s3230_s29 = scalar_select %p2547_p1, 1, 0 }
   0x9   : > { %p2555_p4 = por %p2547_p1, %p42_p0  ;;  %p2559_p5 = pnand %p1668_p2, %p205_p3 }
   0xa   : > { %s217_s10 = sshll.u32 %s2479_s9, 4  ;;  %s2480_s12 = smov [#allocation6]   ;;  %s2563_s10 = int_to_ptr.vmem [resolvable:$true] %s217_s10 }
   0xb   : > { %s3231_s30 = scalar_select %p2555_p4, 1, 0 }
   0xc   : > { %s3232_s8 = scalar_select %p2559_p5, 1, 0 }
   0xd   : > { %p2199_p6 = pneg %p2559_p5  ;;  %s233_s13 = sshll.u32 %s2480_s12, 4  ;;  %s2573_s13 = int_to_ptr.vmem [resolvable:$true] %s233_s13 }
   0xe   : > { %s2481_s14 = smov [#allocation7]   ;;  %s2321_s18 = scalar_lea.hbm %s3219_s1, 2048 }
   0xf   : > { %p2569_p7 = pnand %p2199_p6, %p2547_p1  ;;  %s2575_s15 = sshll.u32 %s2481_s14, 4  ;;  %s250_s15 = int_to_ptr.vmem [resolvable:$true] %s2575_s15 }
  0x10   : > { %p2322_p8 = scmp.ne.s32.totalorder %s3219_s1, %s2321_s18  ;;  %p2328_p12 = scmp.lt.u32.totalorder %s2321_s18, %s3219_s1 }
  0x11   : > { %p2585_p9 = pneg %p2569_p7 }
  0x13   : > { %p2324_p10 = pnand %p2585_p9, %p2322_p8 }
  0x15   : > { %p2325_p11 = pneg %p2324_p10 }
  0x17   : > { %p2330_p13 = pnand %p2328_p12, %p2325_p11 }
  0x19   : > { %2333 = shalt.err (!%p2330_p13)
}
  0x1a   : > { %s2334_s24 = scalar_lea.vmem %s2563_s10, 2048  ;;  %p2342_p6 = scmp.lt.s32.totalorder %s2563_s10, %s2563_s10 }
  0x1b   : > { %p2335_p0 = scmp.ne.s32.totalorder %s2563_s10, %s2334_s24  ;;  %p2343_p1 = scmp.lt.s32.totalorder %s2334_s24, %s2334_s24 }
  0x1d   : > { %p2337_p2 = pnand %p2335_p0, %p2585_p9  ;;  %p2344_p8 = por %p2343_p1, %p2342_p6 }
  0x1f   : > { %p2338_p3 = pneg %p2337_p2 }
  0x21   : > { %p2345_p10 = pnand %p2344_p8, %p2338_p3 }
  0x23   : > { %2348 = shalt.err (!%p2345_p10)
}
  0x24   : > { %s2482_s9 = smov 128   ;;  %s2483_s12 = smov 8  }
  0x25   : > { %2202 = dma.hbm_to_vmem [thread:$0]  (!%p2569_p7), %s3219_s1, 2048, %s2563_s10, [#allocation5], %s2482_s9, %s2482_s9, %s2483_s12  }
  0x26   : > { %s2349_s19 = scalar_lea.hbm %s3221_s3, 2048 }
  0x27   : > { %p2350_p1 = scmp.ne.s32.totalorder %s3221_s3, %s2349_s19  ;;  %p2356_p13 = scmp.lt.u32.totalorder %s2349_s19, %s3221_s3 }
  0x29   : > { %p2352_p11 = pnand %p2350_p1, %p2585_p9 }
  0x2b   : > { %p2353_p12 = pneg %p2352_p11 }
  0x2d   : > { %p2358_p0 = pnand %p2356_p13, %p2353_p12 }
  0x2f   : > { %2361 = shalt.err (!%p2358_p0)
}
  0x30   : > { %s2362_s10 = scalar_lea.vmem %s2573_s13, 2048  ;;  %p2370_p8 = scmp.lt.s32.totalorder %s2573_s13, %s2573_s13 }
  0x31   : > { %p2363_p2 = scmp.ne.s32.totalorder %s2573_s13, %s2362_s10  ;;  %p2371_p10 = scmp.lt.s32.totalorder %s2362_s10, %s2362_s10 }
  0x33   : > { %p2365_p3 = pnand %p2363_p2, %p2585_p9  ;;  %p2372_p1 = por %p2371_p10, %p2370_p8 }
  0x35   : > { %p2366_p6 = pneg %p2365_p3 }
  0x37   : > { %p2373_p11 = pnand %p2372_p1, %p2366_p6 }
  0x39   : > { %2376 = shalt.err (!%p2373_p11)
}
  0x3a   : > { %2205 = dma.hbm_to_vmem [thread:$0]  (!%p2569_p7), %s3221_s3, 2048, %s2573_s13, [#allocation5], %s2482_s9, %s2482_s9, %s2483_s12  }
  0x3b   : > { %s2377_s19 = scalar_lea.hbm %s3223_s5, 2048 }
  0x3c   : > { %p2378_p12 = scmp.ne.s32.totalorder %s3223_s5, %s2377_s19  ;;  %p2384_p2 = scmp.lt.u32.totalorder %s2377_s19, %s3223_s5 }
  0x3e   : > { %p2380_p13 = pnand %p2378_p12, %p2585_p9 }
  0x40   : > { %p2381_p0 = pneg %p2380_p13 }
  0x42   : > { %p2386_p3 = pnand %p2384_p2, %p2381_p0 }
  0x44   : > { %2389 = shalt.err (!%p2386_p3)
}
  0x45   : > { %s2390_s10 = scalar_lea.vmem %s250_s15, 2048  ;;  %p2398_p1 = scmp.lt.s32.totalorder %s250_s15, %s250_s15 }
  0x46   : > { %p2391_p6 = scmp.ne.s32.totalorder %s250_s15, %s2390_s10  ;;  %p2399_p11 = scmp.lt.s32.totalorder %s2390_s10, %s2390_s10 }
  0x48   : > { %p2393_p8 = pnand %p2391_p6, %p2585_p9  ;;  %p2400_p4 = por %p2399_p11, %p2398_p1 }
  0x4a   : > { %p2394_p10 = pneg %p2393_p8 }
  0x4c   : > { %p2401_p5 = pnand %p2400_p4, %p2394_p10 }
  0x4e   : > { %2404 = shalt.err (!%p2401_p5)
}
  0x4f   : > { %2208 = dma.hbm_to_vmem [thread:$0]  (!%p2569_p7), %s3223_s5, 2048, %s250_s15, [#allocation8], %s2482_s9, %s2482_s9, %s2483_s12  }
  0x50   : > { %s2658_s21 = sadd.s32 1, %s2477_s27   ;;  %s29_s16 = sadd.s32 1, %s2473_s26 }
  0x51   : > { %s26_s11 = ssub.s32 %s2477_s27, %s2658_s21  ;;  %p36_p5 = scmp.ne.s32.totalorder %s2473_s26, %s2469_s25 }
  0x52   : > { %p27_p4 = scmp.eq.s32.totalorder %s26_s11, 0  ;;  %p37_p9 = scmp.eq.s32.totalorder %s2477_s27, 0 }
  0x53   : > { %p2216_p12 = scmp.lt.s32.totalorder %s2477_s27, 2  ;;  %s266_s18 = sand.u32 1, %s2473_s26  }
  0x54   : > { %s2668_s17 = scalar_select %p27_p4, %s2473_s26, %s29_s16  }
  0x55   : > { %p38_p13 = por %p37_p9, %p36_p5  ;;  %s1673_s19 = sshll.u32 %s266_s18, 8 }
  0x56   : > { %s1688_s20 = sshll.u32 %s2477_s27, 12  ;;  %s270_s15 = scalar_lea.vmem [#allocation2], %s1673_s19 }
  0x57   : > { %s2675_s24 = scalar_lea.hbm %s3218_s0, %s1688_s20  ;;  %s277_s10 = sshll.u32 %s270_s15, 4  ;;  %s2677_s10 = int_to_ptr.vmem [resolvable:$true] %s277_s10 }
  0x58   : > { %p2679_p7 = pnand %p2216_p12, %p38_p13  ;;  %s2683_s14 = scalar_lea.sflag [#allocation3], %s266_s18 }
  0x59   : > { %s2405_s11 = scalar_lea.hbm %s2675_s24, 4096  ;;  %s2410_s20 = scalar_lea.hbm %s3218_s0, 8192 }
  0x5a   : > { %p2406_p0 = scmp.ne.s32.totalorder %s2675_s24, %s2405_s11  ;;  %p2407_p2 = pneg %p2679_p7 }
  0x5b   : > { %p2411_p8 = scmp.lt.u32.totalorder %s2675_s24, %s3218_s0  ;;  %p2412_p10 = scmp.lt.u32.totalorder %s2410_s20, %s2405_s11 }
  0x5c   : > { %p2408_p3 = pnand %p2407_p2, %p2406_p0  ;;  %p2414_p11 = scmp.lt.u32.totalorder %s2405_s11, %s2675_s24 }
  0x5d   : > { %p2413_p1 = por %p2412_p10, %p2411_p8 }
  0x5e   : > { %p2409_p6 = pneg %p2408_p3 }
  0x5f   : > { %p2415_p4 = por %p2414_p11, %p2413_p1 }
  0x61   : > { %p2416_p5 = pnand %p2415_p4, %p2409_p6 }
  0x63   : > { %2419 = shalt.err (!%p2416_p5)
}
  0x64   : > { %s2420_s18 = scalar_lea.vmem %s2677_s10, 4096  ;;  %s2484_s15 = smov [#allocation2]  }
  0x65   : > { %p2421_p9 = scmp.ne.s32.totalorder %s2677_s10, %s2420_s18  ;;  %s2425_s16 = sshll.u32 %s2484_s15, 4  ;;  %s2426_s16 = int_to_ptr.vmem [resolvable:$false] %s2425_s16 }
  0x66   : > { %s2427_s19 = scalar_lea.vmem %s2426_s16, 8192  ;;  %p2428_p0 = scmp.lt.s32.totalorder %s2677_s10, %s2426_s16 }
  0x67   : > { %p2423_p12 = pnand %p2421_p9, %p2407_p2  ;;  %p2429_p3 = scmp.lt.s32.totalorder %s2427_s19, %s2420_s18 }
  0x69   : > { %p2424_p13 = pneg %p2423_p12  ;;  %p2430_p8 = por %p2429_p3, %p2428_p0 }
  0x6b   : > { %p2431_p10 = pnand %p2430_p8, %p2424_p13 }
  0x6d   : > { %2434 = shalt.err (!%p2431_p10)
}
  0x6e   : > { %2212 = dma.hbm_to_vmem [thread:$0]  (!%p2679_p7), %s2675_s24, 4096, %s2677_s10, %s2683_s14, %s2482_s9, %s2482_s9, %s2483_s12  }
  0x6f   : > { %p3236_p2 = scmp.ne.s32.totalorder %s3232_s8, 0 }
  0x70   : > { %s291_s11 = sand.u32 (!%p3236_p2), 1, %s2469_s25   ;;  %p3237_p6 = scmp.ne.s32.totalorder (!%p3236_p2), %s3231_s30, 0 }
  0x71   : > { %289 = sbr.rel (%p3236_p2) target bundleno = 1150 (0x47e), region = 48  ;;  %s1677_s20 = sshll.u32 (!%p3236_p2), %s291_s11, 8 }
  0x72   : > { %s292_s22 = scalar_lea.sflag (!%p3236_p2), [#allocation3], %s291_s11  ;;  %s2717_s23 = scalar_lea.vmem (!%p3236_p2), [#allocation2], %s1677_s20 }
  0x78   : > { %2452 = dma.done.wait (%p3237_p6), %s292_s22, 4096  }
  0x79   : > { %2454 = vsyncadd (%p3237_p6), %s292_s22, 4294963200  ;;  %p3238_p1 = scmp.ne.s32.totalorder %s3230_s29, 0 }
  0x7b   : > { %2456 = dma.done.wait (%p3238_p1), [#allocation5], 4096  }
  0x7c   : > { %2458 = vsyncadd (%p3238_p1), [#allocation5], 4294963200 }
  0x7d   : > { %2460 = dma.done.wait (%p3238_p1), [#allocation8], 2048  }
  0x7e   : > { %2462 = vsyncadd (%p3238_p1), [#allocation8], 4294965248  ;;  %v2732_v0 = vld [vmem:[%s2717_s23] sm:$0xff]  ;;  %v2735_v1 = vld [vmem:[%s2717_s23 + $0x10] sm:$0xff]  ;;  %s1681_s12 = sshll.u32 %s1666_s28, 5 }
  0x7f   : > { %377 = vadd.xlane.f32.xlu0 %v2732_v0  ;;  %381 = vadd.xlane.f32.xlu1 %v2735_v1  ;;  %v2740_v2 = vld [vmem:[%s2717_s23 + $0x8] sm:$0xff]  ;;  %v2743_v3 = vld [vmem:[%s2717_s23 + $0x18] sm:$0xff]  ;;  %v2748_v4 = vld [vmem:[%s2717_s23 + $0x20] sm:$0xff]  ;;  %p340_p7 = scmp.lt.s32.totalorder %s1681_s12, 63 }
  0x80   : > { %v2751_v5 = vld [vmem:[%s2717_s23 + $0x28] sm:$0xff]  ;;  %v2756_v6 = vld [vmem:[%s2717_s23 + $0x30] sm:$0xff]  ;;  %v2759_v7 = vld [vmem:[%s2717_s23 + $0x38] sm:$0xff] }
  0x81   : > { %v2764_v8 = vld [vmem:[%s2717_s23 + $0x40] sm:$0xff]  ;;  %v2767_v9 = vld [vmem:[%s2717_s23 + $0x48] sm:$0xff]  ;;  %v2772_v10 = vld [vmem:[%s2717_s23 + $0x50] sm:$0xff]  ;;  %s3244_s12 = smov (!%p340_p7, %s1681_s12), 63 }
  0x82   : > { %v2775_v11 = vld [vmem:[%s2717_s23 + $0x58] sm:$0xff]  ;;  %v2780_v12 = vld [vmem:[%s2717_s23 + $0x60] sm:$0xff]  ;;  %v2783_v13 = vld [vmem:[%s2717_s23 + $0x68] sm:$0xff]  ;;  %s1682_s24 = sshll.u32 %s3244_s12, 3 }
  0x83   : > { %379 = vadd.xlane.f32.xlu0 %v2740_v2  ;;  %383 = vadd.xlane.f32.xlu1 %v2743_v3  ;;  %v2788_v14 = vld [vmem:[%s2717_s23 + $0x70] sm:$0xff]  ;;  %v2791_v15 = vld [vmem:[%s2717_s23 + $0x78] sm:$0xff]  ;;  %v2796_v16 = vld [vmem:[%s2717_s23 + $0x80] sm:$0xff]  ;;  %s3139_s15 = scalar_lea.vmem %s3225_s7, %s1682_s24 }
  0x84   : > { %v2799_v17 = vld [vmem:[%s2717_s23 + $0x88] sm:$0xff]  ;;  %v2804_v18 = vld [vmem:[%s2717_s23 + $0x90] sm:$0xff]  ;;  %v2807_v19 = vld [vmem:[%s2717_s23 + $0x98] sm:$0xff] }
  0x85   : > { %v2812_v20 = vld [vmem:[%s2717_s23 + $0xa0] sm:$0xff]  ;;  %v2815_v21 = vld [vmem:[%s2717_s23 + $0xa8] sm:$0xff]  ;;  %v2820_v22 = vld [vmem:[%s2717_s23 + $0xb0] sm:$0xff] }
  0x86   : > { %v2823_v23 = vld [vmem:[%s2717_s23 + $0xb8] sm:$0xff]  ;;  %v2828_v24 = vld [vmem:[%s2717_s23 + $0xc0] sm:$0xff]  ;;  %v2831_v25 = vld [vmem:[%s2717_s23 + $0xc8] sm:$0xff] }
  0x87   : > { %385 = vadd.xlane.f32.xlu0 %v2748_v4  ;;  %387 = vadd.xlane.f32.xlu1 %v2751_v5  ;;  %v2836_v26 = vld [vmem:[%s2717_s23 + $0xd0] sm:$0xff]  ;;  %v2839_v27 = vld [vmem:[%s2717_s23 + $0xd8] sm:$0xff]  ;;  %v2844_v28 = vld [vmem:[%s2717_s23 + $0xe0] sm:$0xff] }
  0x88   : > { %v2847_v29 = vld [vmem:[%s2717_s23 + $0xe8] sm:$0xff]  ;;  %v2852_v30 = vld [vmem:[%s2717_s23 + $0xf0] sm:$0xff]  ;;  %v2855_v31 = vld [vmem:[%s2717_s23 + $0xf8] sm:$0xff] }
  0x89   : > { %v730_v32 = vld [vmem:[#allocation4] sm:$0xff]  ;;  %v731_v33 = vld [vmem:[#allocation4 + $0x8] sm:$0xff]  ;;  %v732_v34 = vld [vmem:[#allocation4 + $0x10] sm:$0xff] }
  0x8a   : > { %v2073_v35 = vpack.c.bf16 %v731_v33, %v730_v32  ;;  %v733_v36 = vld [vmem:[#allocation4 + $0x18] sm:$0xff]  ;;  %v734_v38 = vld [vmem:[#allocation4 + $0x20] sm:$0xff]  ;;  %v735_v39 = vld [vmem:[#allocation4 + $0x28] sm:$0xff] }
  0x8b   : > { %389 = vadd.xlane.f32.xlu0 %v2756_v6  ;;  %391 = vadd.xlane.f32.xlu1 %v2759_v7  ;;  %v2077_v37 = vpack.c.bf16 %v733_v36, %v732_v34  ;;  %v2081_v40 = vpack.c.bf16 %v735_v39, %v734_v38  ;;  %v736_v39 = vld [vmem:[#allocation4 + $0x30] sm:$0xff] }
  0x8c   : > { %2074 = vmatprep.subr.bf16.mxu0 %v2073_v35  ;;  %2169 = vmatprep.subr.bf16.mxu1 %v2073_v35 }
  0x8d   : > { %2076 = vmatpush3.bf16.msra.mxu0 %v2073_v35  ;;  %2177 = vmatpush3.bf16.msra.mxu1 %v2073_v35 }
  0x8e   : > { %2078 = vmatprep.subr.bf16.mxu0 %v2077_v37  ;;  %2170 = vmatprep.subr.bf16.mxu1 %v2077_v37 }
  0x8f   : > { %393 = vadd.xlane.f32.xlu0 %v2764_v8  ;;  %395 = vadd.xlane.f32.xlu1 %v2767_v9 }
  0x91   : > { %2080 = vmatpush3.bf16.msra.mxu0 %v2077_v37  ;;  %2178 = vmatpush3.bf16.msra.mxu1 %v2077_v37 }
  0x92   : > { %2082 = vmatprep.subr.bf16.mxu0 %v2081_v40  ;;  %2171 = vmatprep.subr.bf16.mxu1 %v2081_v40 }
  0x93   : > { %397 = vadd.xlane.f32.xlu0 %v2772_v10  ;;  %399 = vadd.xlane.f32.xlu1 %v2775_v11 }
  0x95   : > { %2084 = vmatpush3.bf16.msra.mxu0 %v2081_v40  ;;  %2179 = vmatpush3.bf16.msra.mxu1 %v2081_v40  ;;  %v737_v40 = vld [vmem:[#allocation4 + $0x38] sm:$0xff] }
  0x97   : > { %401 = vadd.xlane.f32.xlu0 %v2780_v12  ;;  %403 = vadd.xlane.f32.xlu1 %v2783_v13 }
  0x9b   : > { %405 = vadd.xlane.f32.xlu0 %v2788_v14  ;;  %407 = vadd.xlane.f32.xlu1 %v2791_v15 }
  0x9f   : > { %409 = vadd.xlane.f32.xlu0 %v2796_v16  ;;  %411 = vadd.xlane.f32.xlu1 %v2799_v17 }
  0xa3   : > { %413 = vadd.xlane.f32.xlu0 %v2804_v18  ;;  %415 = vadd.xlane.f32.xlu1 %v2807_v19 }
  0xa7   : > { %417 = vadd.xlane.f32.xlu0 %v2812_v20  ;;  %419 = vadd.xlane.f32.xlu1 %v2815_v21 }
  0xab   : > { %421 = vadd.xlane.f32.xlu0 %v2820_v22  ;;  %423 = vadd.xlane.f32.xlu1 %v2823_v23 }
  0xaf   : > { %425 = vadd.xlane.f32.xlu0 %v2828_v24  ;;  %427 = vadd.xlane.f32.xlu1 %v2831_v25 }
  0xb3   : > { %429 = vadd.xlane.f32.xlu0 %v2836_v26  ;;  %431 = vadd.xlane.f32.xlu1 %v2839_v27 }
  0xb7   : > { %433 = vadd.xlane.f32.xlu0 %v2844_v28  ;;  %435 = vadd.xlane.f32.xlu1 %v2847_v29 }
  0xbb   : > { %437 = vadd.xlane.f32.xlu0 %v2852_v30  ;;  %439 = vadd.xlane.f32.xlu1 %v2855_v31 }
 0x10c   : > { %v378_v41 = vpop.xlane.xlu0 %377  ;;  %v382_v42 = vpop.xlane.xlu1 %381 }
 0x10d   : > { %v442_v43 = vmul.f32 0.0078125, %v378_v41  ;;  %v444_v44 = vmul.f32 0.0078125, %v382_v42 }
 0x10f   : > { %v2860_v45 = vsub.f32 %v2732_v0, %v442_v43  ;;  %v2863_v46 = vsub.f32 %v2735_v1, %v444_v44  ;;  %v2085_v43 = vpack.c.bf16 %v737_v40, %v736_v39  ;;  %v743_v39 = vld [vmem:[#allocation4 + $0x68] sm:$0xff] }
 0x110   : > { %v380_v47 = vpop.xlane.xlu0 %379  ;;  %v384_v48 = vpop.xlane.xlu1 %383 }
 0x111   : > { %v443_v49 = vmul.f32 0.0078125, %v380_v47  ;;  %v506_v50 = vmul.f32 %v2860_v45, %v2860_v45  ;;  %v445_v51 = vmul.f32 0.0078125, %v384_v48  ;;  %v508_v54 = vmul.f32 %v2863_v46, %v2863_v46  ;;  %2086 = vmatprep.subr.bf16.mxu0 %v2085_v43  ;;  %2172 = vmatprep.subr.bf16.mxu1 %v2085_v43 }
 0x112   : > { %2088 = vmatpush3.bf16.msra.mxu0 %v2085_v43  ;;  %2180 = vmatpush3.bf16.msra.mxu1 %v2085_v43 }
 0x113   : > { %v2868_v52 = vsub.f32 %v2740_v2, %v443_v49  ;;  %538 = vadd.xlane.f32.xlu0 %v506_v50  ;;  %v2871_v53 = vsub.f32 %v2743_v3, %v445_v51 }
 0x114   : > { %v386_v55 = vpop.xlane.xlu0 %385  ;;  %v388_v56 = vpop.xlane.xlu1 %387 }
 0x115   : > { %v446_v57 = vmul.f32 0.0078125, %v386_v55  ;;  %v507_v58 = vmul.f32 %v2868_v52, %v2868_v52  ;;  %v447_v59 = vmul.f32 0.0078125, %v388_v56  ;;  %v509_v62 = vmul.f32 %v2871_v53, %v2871_v53  ;;  %v739_v55 = vld [vmem:[#allocation4 + $0x48] sm:$0xff] }
 0x117   : > { %v2878_v60 = vsub.f32 %v2748_v4, %v446_v57  ;;  %542 = vadd.xlane.f32.xlu0 %v508_v54  ;;  %540 = vadd.xlane.f32.xlu1 %v507_v58  ;;  %v2881_v61 = vsub.f32 %v2751_v5, %v447_v59  ;;  %v738_v54 = vld [vmem:[#allocation4 + $0x40] sm:$0xff] }
 0x118   : > { %v390_v63 = vpop.xlane.xlu0 %389  ;;  %v392_v0 = vpop.xlane.xlu1 %391  ;;  %v2089_v58 = vpack.c.bf16 %v739_v55, %v738_v54 }
 0x119   : > { %v448_v1 = vmul.f32 0.0078125, %v390_v63  ;;  %v510_v2 = vmul.f32 %v2878_v60, %v2878_v60  ;;  %v449_v3 = vmul.f32 0.0078125, %v392_v0  ;;  %v511_v5 = vmul.f32 %v2881_v61, %v2881_v61 }
 0x11a   : > { %2090 = vmatprep.subr.bf16.mxu0 %v2089_v58  ;;  %2173 = vmatprep.subr.bf16.mxu1 %v2089_v58 }
 0x11b   : > { %v2888_v32 = vsub.f32 %v2756_v6, %v448_v1  ;;  %544 = vadd.xlane.f32.xlu1 %v509_v62  ;;  %546 = vadd.xlane.f32.xlu0 %v510_v2  ;;  %v2891_v4 = vsub.f32 %v2759_v7, %v449_v3  ;;  %v740_v1 = vld [vmem:[#allocation4 + $0x50] sm:$0xff]  ;;  %v741_v2 = vld [vmem:[#allocation4 + $0x58] sm:$0xff] }
 0x11c   : > { %v394_v33 = vpop.xlane.xlu0 %393  ;;  %v396_v34 = vpop.xlane.xlu1 %395  ;;  %2092 = vmatpush3.bf16.msra.mxu0 %v2089_v58  ;;  %2181 = vmatpush3.bf16.msra.mxu1 %v2089_v58 }
 0x11d   : > { %v450_v35 = vmul.f32 0.0078125, %v394_v33  ;;  %v512_v36 = vmul.f32 %v2888_v32, %v2888_v32  ;;  %v451_v37 = vmul.f32 0.0078125, %v396_v34  ;;  %v513_v7 = vmul.f32 %v2891_v4, %v2891_v4 }
 0x11e   : > { %v2093_v33 = vpack.c.bf16 %v741_v2, %v740_v1 }
 0x11f   : > { %v2898_v38 = vsub.f32 %v2764_v8, %v450_v35  ;;  %548 = vadd.xlane.f32.xlu1 %v511_v5  ;;  %550 = vadd.xlane.f32.xlu0 %v512_v36  ;;  %v2901_v6 = vsub.f32 %v2767_v9, %v451_v37 }
 0x120   : > { %v398_v41 = vpop.xlane.xlu0 %397  ;;  %v400_v42 = vpop.xlane.xlu1 %399  ;;  %2094 = vmatprep.subr.bf16.mxu0 %v2093_v33  ;;  %2174 = vmatprep.subr.bf16.mxu1 %v2093_v33 }
 0x121   : > { %v452_v44 = vmul.f32 0.0078125, %v398_v41  ;;  %v514_v47 = vmul.f32 %v2898_v38, %v2898_v38  ;;  %v453_v48 = vmul.f32 0.0078125, %v400_v42  ;;  %v515_v49 = vmul.f32 %v2901_v6, %v2901_v6  ;;  %2096 = vmatpush3.bf16.msra.mxu0 %v2093_v33  ;;  %2182 = vmatpush3.bf16.msra.mxu1 %v2093_v33 }
 0x123   : > { %v2908_v8 = vsub.f32 %v2772_v10, %v452_v44  ;;  %552 = vadd.xlane.f32.xlu1 %v513_v7  ;;  %554 = vadd.xlane.f32.xlu0 %v514_v47  ;;  %v2911_v9 = vsub.f32 %v2775_v11, %v453_v48  ;;  %v742_v7 = vld [vmem:[#allocation4 + $0x60] sm:$0xff] }
 0x124   : > { %v402_v50 = vpop.xlane.xlu0 %401  ;;  %v404_v51 = vpop.xlane.xlu1 %403  ;;  %v2097_v42 = vpack.c.bf16 %v743_v39, %v742_v7 }
 0x125   : > { %v454_v56 = vmul.f32 0.0078125, %v402_v50  ;;  %v516_v57 = vmul.f32 %v2908_v8, %v2908_v8  ;;  %v455_v10 = vmul.f32 0.0078125, %v404_v51  ;;  %v517_v62 = vmul.f32 %v2911_v9, %v2911_v9  ;;  %v745_v50 = vld [vmem:[#allocation4 + $0x78] sm:$0xff] }
 0x126   : > { %2098 = vmatprep.subr.bf16.mxu0 %v2097_v42  ;;  %2175 = vmatprep.subr.bf16.mxu1 %v2097_v42 }
 0x127   : > { %v2918_v59 = vsub.f32 %v2780_v12, %v454_v56  ;;  %556 = vadd.xlane.f32.xlu1 %v515_v49  ;;  %558 = vadd.xlane.f32.xlu0 %v516_v57  ;;  %v2921_v11 = vsub.f32 %v2783_v13, %v455_v10  ;;  %v744_v49 = vld [vmem:[#allocation4 + $0x70] sm:$0xff] }
 0x128   : > { %v406_v63 = vpop.xlane.xlu0 %405  ;;  %v408_v0 = vpop.xlane.xlu1 %407  ;;  %2100 = vmatpush3.bf16.msra.mxu0 %v2097_v42  ;;  %2183 = vmatpush3.bf16.msra.mxu1 %v2097_v42  ;;  %v2101_v55 = vpack.c.bf16 %v745_v50, %v744_v49 }
 0x129   : > { %v456_v3 = vmul.f32 0.0078125, %v406_v63  ;;  %v518_v5 = vmul.f32 %v2918_v59, %v2918_v59  ;;  %v457_v12 = vmul.f32 0.0078125, %v408_v0  ;;  %v519_v35 = vmul.f32 %v2921_v11, %v2921_v11 }
 0x12a   : > { %2102 = vmatprep.subr.bf16.mxu0 %v2101_v55  ;;  %2176 = vmatprep.subr.bf16.mxu1 %v2101_v55 }
 0x12b   : > { %v2928_v13 = vsub.f32 %v2788_v14, %v456_v3  ;;  %560 = vadd.xlane.f32.xlu1 %v517_v62  ;;  %562 = vadd.xlane.f32.xlu0 %v518_v5  ;;  %v2931_v34 = vsub.f32 %v2791_v15, %v457_v12 }
 0x12c   : > { %v410_v36 = vpop.xlane.xlu0 %409  ;;  %v412_v37 = vpop.xlane.xlu1 %411  ;;  %2104 = vmatpush3.bf16.msra.mxu0 %v2101_v55  ;;  %2184 = vmatpush3.bf16.msra.mxu1 %v2101_v55 }
 0x12d   : > { %v458_v40 = vmul.f32 0.0078125, %v410_v36  ;;  %v520_v41 = vmul.f32 %v2928_v13, %v2928_v13  ;;  %v459_v14 = vmul.f32 0.0078125, %v412_v37  ;;  %v521_v44 = vmul.f32 %v2931_v34, %v2931_v34 }
 0x12f   : > { %v2938_v15 = vsub.f32 %v2796_v16, %v458_v40  ;;  %564 = vadd.xlane.f32.xlu1 %v519_v35  ;;  %566 = vadd.xlane.f32.xlu0 %v520_v41  ;;  %v2941_v43 = vsub.f32 %v2799_v17, %v459_v14 }
 0x130   : > { %v414_v47 = vpop.xlane.xlu0 %413  ;;  %v416_v48 = vpop.xlane.xlu1 %415 }
 0x131   : > { %v460_v51 = vmul.f32 0.0078125, %v414_v47  ;;  %v522_v54 = vmul.f32 %v2938_v15, %v2938_v15  ;;  %v461_v16 = vmul.f32 0.0078125, %v416_v48  ;;  %v523_v57 = vmul.f32 %v2941_v43, %v2941_v43 }
 0x133   : > { %v2948_v17 = vsub.f32 %v2804_v18, %v460_v51  ;;  %568 = vadd.xlane.f32.xlu1 %v521_v44  ;;  %570 = vadd.xlane.f32.xlu0 %v522_v54  ;;  %v2951_v56 = vsub.f32 %v2807_v19, %v461_v16 }
 0x134   : > { %v418_v10 = vpop.xlane.xlu0 %417  ;;  %v420_v58 = vpop.xlane.xlu1 %419 }
 0x135   : > { %v462_v62 = vmul.f32 0.0078125, %v418_v10  ;;  %v524_v63 = vmul.f32 %v2948_v17, %v2948_v17  ;;  %v463_v0 = vmul.f32 0.0078125, %v420_v58  ;;  %v525_v1 = vmul.f32 %v2951_v56, %v2951_v56 }
 0x137   : > { %v2958_v18 = vsub.f32 %v2812_v20, %v462_v62  ;;  %572 = vadd.xlane.f32.xlu1 %v523_v57  ;;  %574 = vadd.xlane.f32.xlu0 %v524_v63  ;;  %v2961_v19 = vsub.f32 %v2815_v21, %v463_v0 }
 0x138   : > { %v422_v2 = vpop.xlane.xlu0 %421  ;;  %v424_v3 = vpop.xlane.xlu1 %423 }
 0x139   : > { %v464_v5 = vmul.f32 0.0078125, %v422_v2  ;;  %v526_v12 = vmul.f32 %v2958_v18, %v2958_v18  ;;  %v465_v33 = vmul.f32 0.0078125, %v424_v3  ;;  %v527_v21 = vmul.f32 %v2961_v19, %v2961_v19 }
 0x13b   : > { %v2968_v35 = vsub.f32 %v2820_v22, %v464_v5  ;;  %576 = vadd.xlane.f32.xlu1 %v525_v1  ;;  %578 = vadd.xlane.f32.xlu0 %v526_v12  ;;  %v2971_v20 = vsub.f32 %v2823_v23, %v465_v33  ;;  %v1010_v5 = vld [vmem:[#allocation6] sm:$0xff] }
 0x13c   : > { %v426_v36 = vpop.xlane.xlu0 %425  ;;  %v428_v37 = vpop.xlane.xlu1 %427 }
 0x13d   : > { %v466_v7 = vmul.f32 0.0078125, %v426_v36  ;;  %v528_v39 = vmul.f32 %v2968_v35, %v2968_v35  ;;  %v467_v40 = vmul.f32 0.0078125, %v428_v37  ;;  %v529_v23 = vmul.f32 %v2971_v20, %v2971_v20 }
 0x13f   : > { %v2978_v41 = vsub.f32 %v2828_v24, %v466_v7  ;;  %580 = vadd.xlane.f32.xlu1 %v527_v21  ;;  %582 = vadd.xlane.f32.xlu0 %v528_v39  ;;  %v2981_v22 = vsub.f32 %v2831_v25, %v467_v40 }
 0x140   : > { %v430_v14 = vpop.xlane.xlu0 %429  ;;  %v432_v42 = vpop.xlane.xlu1 %431 }
 0x141   : > { %v468_v44 = vmul.f32 0.0078125, %v430_v14  ;;  %v530_v47 = vmul.f32 %v2978_v41, %v2978_v41  ;;  %v469_v48 = vmul.f32 0.0078125, %v432_v42  ;;  %v531_v25 = vmul.f32 %v2981_v22, %v2981_v22 }
 0x143   : > { %v2988_v49 = vsub.f32 %v2836_v26, %v468_v44  ;;  %584 = vadd.xlane.f32.xlu1 %v529_v23  ;;  %586 = vadd.xlane.f32.xlu0 %v530_v47  ;;  %v2991_v24 = vsub.f32 %v2839_v27, %v469_v48 }
 0x144   : > { %v434_v50 = vpop.xlane.xlu0 %433  ;;  %v436_v51 = vpop.xlane.xlu1 %435 }
 0x145   : > { %v470_v54 = vmul.f32 0.0078125, %v434_v50  ;;  %v532_v16 = vmul.f32 %v2988_v49, %v2988_v49  ;;  %v471_v55 = vmul.f32 0.0078125, %v436_v51  ;;  %v533_v27 = vmul.f32 %v2991_v24, %v2991_v24 }
 0x147   : > { %v2998_v57 = vsub.f32 %v2844_v28, %v470_v54  ;;  %588 = vadd.xlane.f32.xlu1 %v531_v25  ;;  %590 = vadd.xlane.f32.xlu0 %v532_v16  ;;  %v3001_v26 = vsub.f32 %v2847_v29, %v471_v55 }
 0x148   : > { %v438_v10 = vpop.xlane.xlu0 %437  ;;  %v440_v58 = vpop.xlane.xlu1 %439 }
 0x149   : > { %v472_v62 = vmul.f32 0.0078125, %v438_v10  ;;  %v534_v63 = vmul.f32 %v2998_v57, %v2998_v57  ;;  %v473_v0 = vmul.f32 0.0078125, %v440_v58  ;;  %v535_v29 = vmul.f32 %v3001_v26, %v3001_v26 }
 0x14b   : > { %v3008_v1 = vsub.f32 %v2852_v30, %v472_v62  ;;  %592 = vadd.xlane.f32.xlu1 %v533_v27  ;;  %594 = vadd.xlane.f32.xlu0 %v534_v63  ;;  %v3011_v28 = vsub.f32 %v2855_v31, %v473_v0  ;;  %v1011_v30 = vld [vmem:[#allocation6 + $0x8] sm:$0xff] }
 0x14c   : > { %v3019_v12 = vpack.c.bf16 %v1011_v30, %v1010_v5 }
 0x14d   : > { %v536_v2 = vmul.f32 %v3008_v1, %v3008_v1  ;;  %v537_v3 = vmul.f32 %v3011_v28, %v3011_v28 }
 0x14e   : > { %2106 = vmatprep.subr.bf16.mxu1 %v3019_v12 }
 0x14f   : > { %596 = vadd.xlane.f32.xlu1 %v535_v29  ;;  %598 = vadd.xlane.f32.xlu0 %v536_v2 }
 0x153   : > { %600 = vadd.xlane.f32.xlu1 %v537_v3 }
 0x1a0   : > { %v539_v31 = vpop.xlane.xlu0 %538 }
 0x1a1   : > { %v602_v33 = vmul.f32 0.0078125, %v539_v31 }
 0x1a3   : > { %v634_v21 = vadd.f32 1e-05, %v602_v33 }
 0x1a4   : > { %v541_v36 = vpop.xlane.xlu1 %540  ;;  %v543_v37 = vpop.xlane.xlu0 %542 }
 0x1a5   : > { %2257 = vrsqrt.f32 %v634_v21  ;;  %v603_v7 = vmul.f32 0.0078125, %v541_v36  ;;  %v604_v39 = vmul.f32 0.0078125, %v543_v37 }
 0x1a7   : > { %v635_v40 = vadd.f32 1e-05, %v603_v7  ;;  %v636_v23 = vadd.f32 1e-05, %v604_v39 }
 0x1a8   : > { %v545_v14 = vpop.xlane.xlu1 %544  ;;  %v547_v42 = vpop.xlane.xlu0 %546 }
 0x1a9   : > { %2259 = vrsqrt.f32 %v635_v40  ;;  %v605_v44 = vmul.f32 0.0078125, %v545_v14  ;;  %v606_v47 = vmul.f32 0.0078125, %v547_v42 }
 0x1aa   : > { %2261 = vrsqrt.f32 %v636_v23 }
 0x1ab   : > { %v637_v48 = vadd.f32 1e-05, %v605_v44  ;;  %v638_v25 = vadd.f32 1e-05, %v606_v47 }
 0x1ac   : > { %v549_v50 = vpop.xlane.xlu1 %548  ;;  %v551_v51 = vpop.xlane.xlu0 %550 }
 0x1ad   : > { %2263 = vrsqrt.f32 %v637_v48  ;;  %v607_v54 = vmul.f32 0.0078125, %v549_v50  ;;  %v608_v16 = vmul.f32 0.0078125, %v551_v51 }
 0x1ae   : > { %2265 = vrsqrt.f32 %v638_v25 }
 0x1af   : > { %v2258_v55 = vpop.eup %2257  ;;  %v639_v27 = vadd.f32 1e-05, %v607_v54  ;;  %v640_v10 = vadd.f32 1e-05, %v608_v16 }
 0x1b0   : > { %v553_v58 = vpop.xlane.xlu1 %552  ;;  %v555_v62 = vpop.xlane.xlu0 %554  ;;  %v698_v63 = vmul.f32 %v2258_v55, %v2860_v45 }
 0x1b1   : > { %2267 = vrsqrt.f32 %v639_v27  ;;  %v609_v0 = vmul.f32 0.0078125, %v553_v58  ;;  %v610_v29 = vmul.f32 0.0078125, %v555_v62 }
 0x1b2   : > { %2269 = vrsqrt.f32 %v640_v10  ;;  %1865 = vmatprep.mubr.f32.mxu0 %v698_v63 }
 0x1b3   : > { %v2260_v2 = vpop.eup %2259  ;;  %v641_v3 = vadd.f32 1e-05, %v609_v0  ;;  %v642_v5 = vadd.f32 1e-05, %v610_v29 }
 0x1b4   : > { %v2262_v30 = vpop.eup %2261  ;;  %v557_v31 = vpop.xlane.xlu1 %556  ;;  %v699_v21 = vmul.f32 %v2260_v2, %v2868_v52 }
 0x1b5   : > { %v559_v33 = vpop.xlane.xlu0 %558  ;;  %2271 = vrsqrt.f32 %v641_v3  ;;  %v611_v36 = vmul.f32 0.0078125, %v557_v31  ;;  %v700_v7 = vmul.f32 %v2262_v30, %v2863_v46 }
 0x1b6   : > { %v612_v37 = vmul.f32 0.0078125, %v559_v33  ;;  %2273 = vrsqrt.f32 %v642_v5  ;;  %1866 = vmatmul.mubr.f32.vlgmr.msra.gmra.mrb[0].mxu0 %v699_v21 }
 0x1b7   : > { %v2264_v45 = vpop.eup %2263  ;;  %v643_v39 = vadd.f32 1e-05, %v611_v36  ;;  %1868 = vmatprep.mubr.f32.mxu0 %v700_v7 }
 0x1b8   : > { %v644_v40 = vadd.f32 1e-05, %v612_v37  ;;  %v2266_v23 = vpop.eup %2265  ;;  %v561_v14 = vpop.xlane.xlu1 %560  ;;  %v701_v44 = vmul.f32 %v2264_v45, %v2871_v53 }
 0x1b9   : > { %v563_v42 = vpop.xlane.xlu0 %562  ;;  %2275 = vrsqrt.f32 %v643_v39  ;;  %v613_v47 = vmul.f32 0.0078125, %v561_v14  ;;  %v702_v52 = vmul.f32 %v2266_v23, %v2878_v60 }
 0x1ba   : > { %v614_v48 = vmul.f32 0.0078125, %v563_v42  ;;  %2277 = vrsqrt.f32 %v644_v40  ;;  %1869 = vmatmul.mubr.f32.gmra.mrb[2].mxu0 %v701_v44 }
 0x1bb   : > { %v2268_v25 = vpop.eup %2267  ;;  %v645_v46 = vadd.f32 1e-05, %v613_v47  ;;  %1871 = vmatprep.mubr.f32.mxu0 %v702_v52 }
 0x1bc   : > { %v646_v50 = vadd.f32 1e-05, %v614_v48  ;;  %v2270_v51 = vpop.eup %2269  ;;  %v565_v54 = vpop.xlane.xlu1 %564  ;;  %v703_v55 = vmul.f32 %v2268_v25, %v2881_v61 }
 0x1bd   : > { %v567_v16 = vpop.xlane.xlu0 %566  ;;  %2279 = vrsqrt.f32 %v645_v46  ;;  %v615_v27 = vmul.f32 0.0078125, %v565_v54  ;;  %v704_v53 = vmul.f32 %v2270_v51, %v2888_v32 }
 0x1be   : > { %v616_v10 = vmul.f32 0.0078125, %v567_v16  ;;  %2281 = vrsqrt.f32 %v646_v50  ;;  %1872 = vmatmul.mubr.f32.gmra.mrb[4].mxu0 %v703_v55 }
 0x1bf   : > { %v2272_v58 = vpop.eup %2271  ;;  %v647_v60 = vadd.f32 1e-05, %v615_v27  ;;  %1874 = vmatprep.mubr.f32.mxu0 %v704_v53 }
 0x1c0   : > { %v648_v62 = vadd.f32 1e-05, %v616_v10  ;;  %v2274_v63 = vpop.eup %2273  ;;  %v569_v0 = vpop.xlane.xlu1 %568  ;;  %v705_v2 = vmul.f32 %v2272_v58, %v2891_v4 }
 0x1c1   : > { %v571_v29 = vpop.xlane.xlu0 %570  ;;  %2283 = vrsqrt.f32 %v647_v60  ;;  %v617_v3 = vmul.f32 0.0078125, %v569_v0  ;;  %v706_v61 = vmul.f32 %v2274_v63, %v2898_v38 }
 0x1c2   : > { %v618_v5 = vmul.f32 0.0078125, %v571_v29  ;;  %2285 = vrsqrt.f32 %v648_v62  ;;  %1875 = vmatmul.mubr.f32.gmra.mrb[6].mxu0 %v705_v2  ;;  %v1012_v29 = vld [vmem:[#allocation6 + $0x10] sm:$0xff]  ;;  %v1013_v2 = vld [vmem:[#allocation6 + $0x18] sm:$0xff] }
 0x1c3   : > { %v2276_v30 = vpop.eup %2275  ;;  %v649_v32 = vadd.f32 1e-05, %v617_v3  ;;  %1877 = vmatprep.mubr.f32.mxu0 %v706_v61 }
 0x1c4   : > { %v650_v31 = vadd.f32 1e-05, %v618_v5  ;;  %v2278_v33 = vpop.eup %2277  ;;  %v573_v21 = vpop.xlane.xlu1 %572  ;;  %v707_v37 = vmul.f32 %v2276_v30, %v2901_v6 }
 0x1c5   : > { %v575_v36 = vpop.xlane.xlu0 %574  ;;  %2287 = vrsqrt.f32 %v649_v32  ;;  %v619_v7 = vmul.f32 0.0078125, %v573_v21  ;;  %v708_v4 = vmul.f32 %v2278_v33, %v2908_v8  ;;  %v2109_v33 = vpack.c.bf16 %v1013_v2, %v1012_v29 }
 0x1c6   : > { %v620_v45 = vmul.f32 0.0078125, %v575_v36  ;;  %2289 = vrsqrt.f32 %v650_v31  ;;  %1878 = vmatmul.mubr.f32.gmra.mrb[8].mxu0 %v707_v37  ;;  %v1015_v37 = vld [vmem:[#allocation6 + $0x28] sm:$0xff] }
 0x1c7   : > { %v2280_v39 = vpop.eup %2279  ;;  %v651_v38 = vadd.f32 1e-05, %v619_v7  ;;  %1880 = vmatprep.mubr.f32.mxu0 %v708_v4 }
 0x1c8   : > { %v652_v40 = vadd.f32 1e-05, %v620_v45  ;;  %v2282_v23 = vpop.eup %2281  ;;  %v577_v14 = vpop.xlane.xlu1 %576  ;;  %v709_v44 = vmul.f32 %v2280_v39, %v2911_v9 }
 0x1c9   : > { %v579_v42 = vpop.xlane.xlu0 %578  ;;  %2291 = vrsqrt.f32 %v651_v38  ;;  %v621_v47 = vmul.f32 0.0078125, %v577_v14  ;;  %v710_v6 = vmul.f32 %v2282_v23, %v2918_v59 }
 0x1ca   : > { %v622_v48 = vmul.f32 0.0078125, %v579_v42  ;;  %2293 = vrsqrt.f32 %v652_v40  ;;  %1881 = vmatmul.mubr.f32.gmra.mrb[10].mxu0 %v709_v44  ;;  %v1016_v44 = vld [vmem:[#allocation6 + $0x30] sm:$0xff] }
 0x1cb   : > { %v2284_v52 = vpop.eup %2283  ;;  %v653_v8 = vadd.f32 1e-05, %v621_v47  ;;  %1883 = vmatprep.mubr.f32.mxu0 %v710_v6  ;;  %v1017_v47 = vld [vmem:[#allocation6 + $0x38] sm:$0xff] }
 0x1cc   : > { %v654_v25 = vadd.f32 1e-05, %v622_v48  ;;  %v2286_v46 = vpop.eup %2285  ;;  %v581_v50 = vpop.xlane.xlu1 %580  ;;  %v711_v54 = vmul.f32 %v2284_v52, %v2921_v11 }
 0x1cd   : > { %v583_v51 = vpop.xlane.xlu0 %582  ;;  %2295 = vrsqrt.f32 %v653_v8  ;;  %v623_v16 = vmul.f32 0.0078125, %v581_v50  ;;  %v712_v9 = vmul.f32 %v2286_v46, %v2928_v13  ;;  %v2117_v46 = vpack.c.bf16 %v1017_v47, %v1016_v44  ;;  %v1301_v44 = vld [vmem:[#allocation7 + $0x58] sm:$0xff] }
 0x1ce   : > { %v624_v55 = vmul.f32 0.0078125, %v583_v51  ;;  %2297 = vrsqrt.f32 %v654_v25  ;;  %1884 = vmatmul.mubr.f32.gmra.mrb[12].mxu0 %v711_v54  ;;  %v1018_v54 = vld [vmem:[#allocation6 + $0x40] sm:$0xff] }
 0x1cf   : > { %v2288_v27 = vpop.eup %2287  ;;  %v655_v59 = vadd.f32 1e-05, %v623_v16  ;;  %1886 = vmatprep.mubr.f32.mxu0 %v712_v9  ;;  %v1019_v16 = vld [vmem:[#allocation6 + $0x48] sm:$0xff] }
 0x1d0   : > { %v656_v10 = vadd.f32 1e-05, %v624_v55  ;;  %v2290_v53 = vpop.eup %2289  ;;  %v585_v58 = vpop.xlane.xlu1 %584  ;;  %v713_v62 = vmul.f32 %v2288_v27, %v2931_v34 }
 0x1d1   : > { %v587_v60 = vpop.xlane.xlu0 %586  ;;  %2299 = vrsqrt.f32 %v655_v59  ;;  %v625_v63 = vmul.f32 0.0078125, %v585_v58  ;;  %v714_v11 = vmul.f32 %v2290_v53, %v2938_v15  ;;  %v1014_v15 = vld [vmem:[#allocation6 + $0x20] sm:$0xff]  ;;  %v2121_v53 = vpack.c.bf16 %v1019_v16, %v1018_v54 }
 0x1d2   : > { %v626_v0 = vmul.f32 0.0078125, %v587_v60  ;;  %2301 = vrsqrt.f32 %v656_v10  ;;  %1887 = vmatmul.mubr.f32.gmra.mrb[14].mxu0 %v713_v62  ;;  %v2113_v23 = vpack.c.bf16 %v1015_v37, %v1014_v15  ;;  %v1021_v62 = vld [vmem:[#allocation6 + $0x58] sm:$0xff]  ;;  %v1290_v15 = vld [vmem:[#allocation7] sm:$0xff]  ;;  %v1291_v37 = vld [vmem:[#allocation7 + $0x8] sm:$0xff] }
 0x1d3   : > { %v2292_v13 = vpop.eup %2291  ;;  %v657_v3 = vadd.f32 1e-05, %v625_v63  ;;  %1889 = vmatprep.mubr.f32.mxu1 %v714_v11 }
 0x1d4   : > { %v658_v5 = vadd.f32 1e-05, %v626_v0  ;;  %v2294_v61 = vpop.eup %2293  ;;  %v589_v30 = vpop.xlane.xlu1 %588  ;;  %v715_v31 = vmul.f32 %v2292_v13, %v2941_v43  ;;  %v1022_v13 = vld [vmem:[#allocation6 + $0x60] sm:$0xff] }
 0x1d5   : > { %v591_v32 = vpop.xlane.xlu0 %590  ;;  %2303 = vrsqrt.f32 %v657_v3  ;;  %v627_v34 = vmul.f32 0.0078125, %v589_v30  ;;  %v716_v36 = vmul.f32 %v2294_v61, %v2948_v17  ;;  %v1023_v3 = vld [vmem:[#allocation6 + $0x68] sm:$0xff] }
 0x1d6   : > { %v628_v21 = vmul.f32 0.0078125, %v591_v32  ;;  %2305 = vrsqrt.f32 %v658_v5  ;;  %1890 = vmatmul.mubr.f32.vlgmr.msra.gmra.mrb[0].mxu1 %v715_v31  ;;  %v2129_v30 = vpack.c.bf16 %v1023_v3, %v1022_v13 }
 0x1d7   : > { %v2296_v7 = vpop.eup %2295  ;;  %v659_v45 = vadd.f32 1e-05, %v627_v34  ;;  %1892 = vmatprep.mubr.f32.mxu1 %v716_v36  ;;  %2108 = vmatpush3.bf16.msra.mxu1 %v3019_v12  ;;  %v1025_v36 = vld [vmem:[#allocation6 + $0x78] sm:$0xff] }
 0x1d8   : > { %v660_v4 = vadd.f32 1e-05, %v628_v21  ;;  %v2298_v39 = vpop.eup %2297  ;;  %v593_v38 = vpop.xlane.xlu1 %592  ;;  %v717_v43 = vmul.f32 %v2296_v7, %v2951_v56  ;;  %2110 = vmatprep.subr.bf16.mxu1 %v2109_v33  ;;  %v1024_v21 = vld [vmem:[#allocation6 + $0x70] sm:$0xff] }
 0x1d9   : > { %v595_v40 = vpop.xlane.xlu0 %594  ;;  %2307 = vrsqrt.f32 %v659_v45  ;;  %v629_v14 = vmul.f32 0.0078125, %v593_v38  ;;  %v718_v42 = vmul.f32 %v2298_v39, %v2958_v18  ;;  %v1292_v7 = vld [vmem:[#allocation7 + $0x10] sm:$0xff]  ;;  %v2137_v45 = vpack.c.bf16 %v1291_v37, %v1290_v15  ;;  %v1294_v39 = vld [vmem:[#allocation7 + $0x20] sm:$0xff] }
 0x1da   : > { %v630_v17 = vmul.f32 0.0078125, %v595_v40  ;;  %2309 = vrsqrt.f32 %v660_v4  ;;  %1893 = vmatmul.mubr.f32.gmra.mrb[2].mxu1 %v717_v43  ;;  %v1296_v40 = vld [vmem:[#allocation7 + $0x30] sm:$0xff] }
 0x1db   : > { %v2300_v48 = vpop.eup %2299  ;;  %v661_v6 = vadd.f32 1e-05, %v629_v14  ;;  %1895 = vmatprep.mubr.f32.mxu1 %v718_v42  ;;  %2112 = vmatpush3.bf16.msra.mxu1 %v2109_v33  ;;  %v1299_v14 = vld [vmem:[#allocation7 + $0x48] sm:$0xff]  ;;  %v1300_v42 = vld [vmem:[#allocation7 + $0x50] sm:$0xff] }
 0x1dc   : > { %v662_v52 = vadd.f32 1e-05, %v630_v17  ;;  %v2302_v12 = vpop.eup %2301  ;;  %v597_v8 = vpop.xlane.xlu1 %596  ;;  %v719_v56 = vmul.f32 %v2300_v48, %v2961_v19  ;;  %2114 = vmatprep.subr.bf16.mxu1 %v2113_v23  ;;  %2138 = vmatprep.subr.bf16.mxu0 %v2137_v45  ;;  %v2157_v47 = vpack.c.bf16 %v1301_v44, %v1300_v42  ;;  %v1302_v48 = vld [vmem:[#allocation7 + $0x60] sm:$0xff] }
 0x1dd   : > { %v599_v25 = vpop.xlane.xlu0 %598  ;;  %2311 = vrsqrt.f32 %v661_v6  ;;  %v631_v50 = vmul.f32 0.0078125, %v597_v8  ;;  %v720_v18 = vmul.f32 %v2302_v12, %v2968_v35  ;;  %v1020_v35 = vld [vmem:[#allocation6 + $0x50] sm:$0xff]  ;;  %2140 = vmatpush3.bf16.msra.mxu0 %v2137_v45  ;;  %v1303_v6 = vld [vmem:[#allocation7 + $0x68] sm:$0xff]  ;;  %v3058_v12 = vld [vmem:[%s3220_s2] ss:$0 sm:$0xff] }
 0x1de   : > { %v632_v51 = vmul.f32 0.0078125, %v599_v25  ;;  %2313 = vrsqrt.f32 %v662_v52  ;;  %1896 = vmatmul.mubr.f32.gmra.mrb[4].mxu1 %v719_v56  ;;  %v2125_v2 = vpack.c.bf16 %v1021_v62, %v1020_v35  ;;  %v2161_v52 = vpack.c.bf16 %v1303_v6, %v1302_v48 }
 0x1df   : > { %v2304_v55 = vpop.eup %2303  ;;  %v663_v9 = vadd.f32 1e-05, %v631_v50  ;;  %1898 = vmatprep.mubr.f32.mxu1 %v720_v18  ;;  %2116 = vmatpush3.bf16.msra.mxu1 %v2113_v23  ;;  %v1298_v23 = vld [vmem:[#allocation7 + $0x40] sm:$0xff] }
 0x1e0   : > { %v664_v27 = vadd.f32 1e-05, %v632_v51  ;;  %v2306_v59 = vpop.eup %2305  ;;  %v601_v10 = vpop.xlane.xlu1 %600  ;;  %v721_v19 = vmul.f32 %v2304_v55, %v2971_v20  ;;  %2118 = vmatprep.subr.bf16.mxu1 %v2117_v46  ;;  %v2153_v17 = vpack.c.bf16 %v1299_v14, %v1298_v23 }
 0x1e1   : > { %2315 = vrsqrt.f32 %v663_v9  ;;  %v633_v58 = vmul.f32 0.0078125, %v601_v10  ;;  %v722_v60 = vmul.f32 %v2306_v59, %v2978_v41 }
 0x1e2   : > { %2317 = vrsqrt.f32 %v664_v27  ;;  %1899 = vmatmul.mubr.f32.gmra.mrb[6].mxu1 %v721_v19 }
 0x1e3   : > { %v2308_v63 = vpop.eup %2307  ;;  %v665_v0 = vadd.f32 1e-05, %v633_v58  ;;  %1901 = vmatprep.mubr.f32.mxu1 %v722_v60  ;;  %2120 = vmatpush3.bf16.msra.mxu1 %v2117_v46 }
 0x1e4   : > { %v2310_v11 = vpop.eup %2309  ;;  %v723_v29 = vmul.f32 %v2308_v63, %v2981_v22  ;;  %2122 = vmatprep.subr.bf16.mxu1 %v2121_v53 }
 0x1e5   : > { %2319 = vrsqrt.f32 %v665_v0  ;;  %v724_v20 = vmul.f32 %v2310_v11, %v2988_v49 }
 0x1e6   : > { %1902 = vmatmul.mubr.f32.gmra.mrb[8].mxu1 %v723_v29 }
 0x1e7   : > { %v2312_v41 = vpop.eup %2311  ;;  %1904 = vmatprep.mubr.f32.mxu1 %v724_v20  ;;  %2124 = vmatpush3.bf16.msra.mxu1 %v2121_v53 }
 0x1e8   : > { %v2314_v5 = vpop.eup %2313  ;;  %v725_v61 = vmul.f32 %v2312_v41, %v2991_v24  ;;  %2126 = vmatprep.subr.bf16.mxu1 %v2125_v2 }
 0x1e9   : > { %v726_v32 = vmul.f32 %v2314_v5, %v2998_v57  ;;  %v2133_v57 = vpack.c.bf16 %v1025_v36, %v1024_v21 }
 0x1ea   : > { %1905 = vmatmul.mubr.f32.gmra.mrb[10].mxu1 %v725_v61 }
 0x1eb   : > { %v2316_v22 = vpop.eup %2315  ;;  %1907 = vmatprep.mubr.f32.mxu1 %v726_v32  ;;  %2128 = vmatpush3.bf16.msra.mxu1 %v2125_v2 }
 0x1ec   : > { %v2318_v31 = vpop.eup %2317  ;;  %v727_v49 = vmul.f32 %v2316_v22, %v3001_v26  ;;  %2130 = vmatprep.subr.bf16.mxu1 %v2129_v30  ;;  %v1293_v26 = vld [vmem:[#allocation7 + $0x18] sm:$0xff] }
 0x1ed   : > { %v728_v33 = vmul.f32 %v2318_v31, %v3008_v1  ;;  %v2141_v4 = vpack.c.bf16 %v1293_v26, %v1292_v7  ;;  %v1295_v1 = vld [vmem:[#allocation7 + $0x28] sm:$0xff] }
 0x1ee   : > { %1908 = vmatmul.mubr.f32.gmra.mrb[12].mxu1 %v727_v49  ;;  %v2145_v38 = vpack.c.bf16 %v1295_v1, %v1294_v39 }
 0x1ef   : > { %v2320_v34 = vpop.eup %2319  ;;  %1910 = vmatprep.mubr.f32.mxu1 %v728_v33  ;;  %2132 = vmatpush3.bf16.msra.mxu1 %v2129_v30 }
 0x1f0   : > { %v729_v24 = vmul.f32 %v2320_v34, %v3011_v28  ;;  %2134 = vmatprep.subr.bf16.mxu1 %v2133_v57  ;;  %2142 = vmatprep.subr.bf16.mxu0 %v2141_v4  ;;  %v1297_v28 = vld [vmem:[#allocation7 + $0x38] sm:$0xff] }
 0x1f1   : > { %2144 = vmatpush3.bf16.msra.mxu0 %v2141_v4  ;;  %v2149_v43 = vpack.c.bf16 %v1297_v28, %v1296_v40 }
 0x1f2   : > { %1911 = vmatmul.mubr.f32.gmra.mrb[14].mxu1 %v729_v24  ;;  %2146 = vmatprep.subr.bf16.mxu0 %v2145_v38 }
 0x1f3   : > { %2136 = vmatpush3.bf16.msra.mxu1 %v2133_v57 }
 0x1f5   : > { %2148 = vmatpush3.bf16.msra.mxu0 %v2145_v38 }
 0x1f6   : > { %2150 = vmatprep.subr.bf16.mxu0 %v2149_v43 }
 0x1f9   : > { %2152 = vmatpush3.bf16.msra.mxu0 %v2149_v43 }
 0x1fa   : > { %2154 = vmatprep.subr.bf16.mxu0 %v2153_v17 }
 0x1fd   : > { %2156 = vmatpush3.bf16.msra.mxu0 %v2153_v17 }
 0x1fe   : > { %2158 = vmatprep.subr.bf16.mxu0 %v2157_v47 }
 0x201   : > { %2160 = vmatpush3.bf16.msra.mxu0 %v2157_v47 }
 0x202   : > { %2162 = vmatprep.subr.bf16.mxu0 %v2161_v52 }
 0x205   : > { %2164 = vmatpush3.bf16.msra.mxu0 %v2161_v52 }
 0x289   : > { %v1867_v8 = vpop.f32.mrb[0].mxu0 }
 0x28a   : > { %v825_v25 = vadd.f32 %v1867_v8, %v3058_v12  ;;  %v819_v56 = vpop.f32.mrb[1].mxu0 }
 0x28b   : > { %v820_v46 = vadd.f32 %v3058_v12, %v819_v56 }
 0x28c   : > { %v979_v18 = vmax.f32 %v825_v25, 0.0 }
 0x28d   : > { %v978_v50 = vmax.f32 %v820_v46, 0.0  ;;  %v1870_v51 = vpop.f32.mrb[2].mxu0 }
 0x28e   : > { %v835_v54 = vadd.f32 %v1870_v51, %v3058_v12  ;;  %v829_v16 = vpop.f32.mrb[3].mxu0 }
 0x28f   : > { %v830_v55 = vadd.f32 %v3058_v12, %v829_v16  ;;  %1945 = vmatprep.mubr.f32.mxu1 %v978_v50 }
 0x290   : > { %1946 = vmatmul.mubr.f32.vlgmr.msra.gmra.mrb[16].mxu1 %v979_v18  ;;  %v981_v59 = vmax.f32 %v835_v54, 0.0 }
 0x291   : > { %v980_v9 = vmax.f32 %v830_v55, 0.0  ;;  %v1873_v27 = vpop.f32.mrb[4].mxu0 }
 0x292   : > { %v845_v10 = vadd.f32 %v1873_v27, %v3058_v12  ;;  %v839_v19 = vpop.f32.mrb[5].mxu0 }
 0x293   : > { %v840_v53 = vadd.f32 %v3058_v12, %v839_v19  ;;  %1948 = vmatprep.mubr.f32.mxu1 %v980_v9 }
 0x294   : > { %1949 = vmatmul.mubr.f32.gmra.mrb[18].mxu1 %v981_v59  ;;  %v983_v35 = vmax.f32 %v845_v10, 0.0 }
 0x295   : > { %v982_v58 = vmax.f32 %v840_v53, 0.0  ;;  %v1876_v60 = vpop.f32.mrb[6].mxu0 }
 0x296   : > { %v855_v62 = vadd.f32 %v1876_v60, %v3058_v12  ;;  %v849_v63 = vpop.f32.mrb[7].mxu0 }
 0x297   : > { %v850_v0 = vadd.f32 %v3058_v12, %v849_v63  ;;  %1951 = vmatprep.mubr.f32.mxu1 %v982_v58 }
 0x298   : > { %1952 = vmatmul.mubr.f32.gmra.mrb[20].mxu1 %v983_v35  ;;  %v985_v2 = vmax.f32 %v855_v62, 0.0 }
 0x299   : > { %v984_v11 = vmax.f32 %v850_v0, 0.0  ;;  %v1879_v29 = vpop.f32.mrb[8].mxu0 }
 0x29a   : > { %v865_v20 = vadd.f32 %v1879_v29, %v3058_v12  ;;  %v859_v13 = vpop.f32.mrb[9].mxu0 }
 0x29b   : > { %v860_v3 = vadd.f32 %v3058_v12, %v859_v13  ;;  %1954 = vmatprep.mubr.f32.mxu1 %v984_v11 }
 0x29c   : > { %1955 = vmatmul.mubr.f32.gmra.mrb[22].mxu1 %v985_v2  ;;  %v987_v61 = vmax.f32 %v865_v20, 0.0 }
 0x29d   : > { %v986_v41 = vmax.f32 %v860_v3, 0.0  ;;  %v1882_v5 = vpop.f32.mrb[10].mxu0 }
 0x29e   : > { %v875_v30 = vadd.f32 %v1882_v5, %v3058_v12  ;;  %v869_v32 = vpop.f32.mrb[11].mxu0 }
 0x29f   : > { %v870_v22 = vadd.f32 %v3058_v12, %v869_v32  ;;  %1957 = vmatprep.mubr.f32.mxu1 %v986_v41 }
 0x2a0   : > { %1958 = vmatmul.mubr.f32.gmra.mrb[24].mxu1 %v987_v61  ;;  %v989_v33 = vmax.f32 %v875_v30, 0.0 }
 0x2a1   : > { %v988_v31 = vmax.f32 %v870_v22, 0.0  ;;  %v1885_v49 = vpop.f32.mrb[12].mxu0  ;;  %v1304_v22 = vld [vmem:[#allocation7 + $0x70] sm:$0xff] }
 0x2a2   : > { %v885_v34 = vadd.f32 %v1885_v49, %v3058_v12  ;;  %v879_v24 = vpop.f32.mrb[13].mxu0 }
 0x2a3   : > { %v880_v21 = vadd.f32 %v3058_v12, %v879_v24  ;;  %1960 = vmatprep.mubr.f32.mxu1 %v988_v31  ;;  %v1305_v31 = vld [vmem:[#allocation7 + $0x78] sm:$0xff] }
 0x2a4   : > { %1961 = vmatmul.mubr.f32.gmra.mrb[26].mxu1 %v989_v33  ;;  %v991_v15 = vmax.f32 %v885_v34, 0.0  ;;  %v2165_v49 = vpack.c.bf16 %v1305_v31, %v1304_v22  ;;  %v3095_v33 = vld [vmem:[%s3222_s4] ss:$0 sm:$0xff] }
 0x2a5   : > { %v990_v36 = vmax.f32 %v880_v21, 0.0  ;;  %v1888_v57 = vpop.f32.mrb[14].mxu0 }
 0x2a6   : > { %v895_v37 = vadd.f32 %v1888_v57, %v3058_v12  ;;  %v889_v7 = vpop.f32.mrb[15].mxu0  ;;  %2166 = vmatprep.subr.bf16.mxu0 %v2165_v49 }
 0x2a7   : > { %v890_v45 = vadd.f32 %v3058_v12, %v889_v7  ;;  %1963 = vmatprep.mubr.f32.mxu1 %v990_v36  ;;  %2168 = vmatpush3.bf16.msra.mxu0 %v2165_v49 }
 0x2a8   : > { %1964 = vmatmul.mubr.f32.gmra.mrb[28].mxu1 %v991_v15  ;;  %v993_v39 = vmax.f32 %v895_v37, 0.0 }
 0x2a9   : > { %v992_v26 = vmax.f32 %v890_v45, 0.0  ;;  %v1891_v4 = vpop.f32.mrb[0].mxu1 }
 0x2aa   : > { %v905_v1 = vadd.f32 %v1891_v4, %v3058_v12  ;;  %v899_v38 = vpop.f32.mrb[1].mxu1 }
 0x2ab   : > { %v900_v40 = vadd.f32 %v3058_v12, %v899_v38  ;;  %1966 = vmatprep.mubr.f32.mxu1 %v992_v26 }
 0x2ac   : > { %1967 = vmatmul.mubr.f32.gmra.mrb[30].mxu1 %v993_v39  ;;  %v995_v23 = vmax.f32 %v905_v1, 0.0 }
 0x2ad   : > { %v994_v28 = vmax.f32 %v900_v40, 0.0  ;;  %v1894_v43 = vpop.f32.mrb[2].mxu1 }
 0x2ae   : > { %v915_v14 = vadd.f32 %v1894_v43, %v3058_v12  ;;  %v909_v17 = vpop.f32.mrb[3].mxu1 }
 0x2af   : > { %v910_v42 = vadd.f32 %v3058_v12, %v909_v17  ;;  %1969 = vmatprep.mubr.f32.mxu1 %v994_v28 }
 0x2b0   : > { %1970 = vmatmul.mubr.f32.gmra.mrb[32].mxu1 %v995_v23  ;;  %v997_v48 = vmax.f32 %v915_v14, 0.0 }
 0x2b1   : > { %v996_v44 = vmax.f32 %v910_v42, 0.0  ;;  %v1897_v47 = vpop.f32.mrb[4].mxu1 }
 0x2b2   : > { %v925_v6 = vadd.f32 %v1897_v47, %v3058_v12  ;;  %v919_v52 = vpop.f32.mrb[5].mxu1 }
 0x2b3   : > { %v920_v8 = vadd.f32 %v3058_v12, %v919_v52  ;;  %1972 = vmatprep.mubr.f32.mxu1 %v996_v44 }
 0x2b4   : > { %1973 = vmatmul.mubr.f32.gmra.mrb[34].mxu1 %v997_v48  ;;  %v999_v46 = vmax.f32 %v925_v6, 0.0 }
 0x2b5   : > { %v998_v25 = vmax.f32 %v920_v8, 0.0  ;;  %v1900_v56 = vpop.f32.mrb[6].mxu1 }
 0x2b6   : > { %v935_v50 = vadd.f32 %v1900_v56, %v3058_v12  ;;  %v929_v51 = vpop.f32.mrb[7].mxu1 }
 0x2b7   : > { %v930_v18 = vadd.f32 %v3058_v12, %v929_v51  ;;  %1975 = vmatprep.mubr.f32.mxu1 %v998_v25 }
 0x2b8   : > { %1976 = vmatmul.mubr.f32.gmra.mrb[36].mxu1 %v999_v46  ;;  %v1001_v55 = vmax.f32 %v935_v50, 0.0 }
 0x2b9   : > { %v1000_v54 = vmax.f32 %v930_v18, 0.0  ;;  %v1903_v16 = vpop.f32.mrb[8].mxu1 }
 0x2ba   : > { %v945_v9 = vadd.f32 %v1903_v16, %v3058_v12  ;;  %v939_v27 = vpop.f32.mrb[9].mxu1 }
 0x2bb   : > { %v940_v59 = vadd.f32 %v3058_v12, %v939_v27  ;;  %1978 = vmatprep.mubr.f32.mxu1 %v1000_v54 }
 0x2bc   : > { %1979 = vmatmul.mubr.f32.gmra.mrb[38].mxu1 %v1001_v55  ;;  %v1003_v53 = vmax.f32 %v945_v9, 0.0 }
 0x2bd   : > { %v1002_v10 = vmax.f32 %v940_v59, 0.0  ;;  %v1906_v19 = vpop.f32.mrb[10].mxu1 }
 0x2be   : > { %v955_v58 = vadd.f32 %v1906_v19, %v3058_v12  ;;  %v949_v60 = vpop.f32.mrb[11].mxu1 }
 0x2bf   : > { %v950_v35 = vadd.f32 %v3058_v12, %v949_v60  ;;  %1981 = vmatprep.mubr.f32.mxu1 %v1002_v10 }
 0x2c0   : > { %1982 = vmatmul.mubr.f32.gmra.mrb[40].mxu1 %v1003_v53  ;;  %v1005_v0 = vmax.f32 %v955_v58, 0.0 }
 0x2c1   : > { %v1004_v62 = vmax.f32 %v950_v35, 0.0  ;;  %v1909_v63 = vpop.f32.mrb[12].mxu1 }
 0x2c2   : > { %v965_v11 = vadd.f32 %v1909_v63, %v3058_v12  ;;  %v959_v29 = vpop.f32.mrb[13].mxu1 }
 0x2c3   : > { %v960_v2 = vadd.f32 %v3058_v12, %v959_v29  ;;  %1984 = vmatprep.mubr.f32.mxu1 %v1004_v62 }
 0x2c4   : > { %1985 = vmatmul.mubr.f32.gmra.mrb[42].mxu1 %v1005_v0  ;;  %v1007_v3 = vmax.f32 %v965_v11, 0.0 }
 0x2c5   : > { %v1006_v20 = vmax.f32 %v960_v2, 0.0  ;;  %v1912_v13 = vpop.f32.mrb[14].mxu1 }
 0x2c6   : > { %v975_v41 = vadd.f32 %v1912_v13, %v3058_v12  ;;  %v969_v5 = vpop.f32.mrb[15].mxu1 }
 0x2c7   : > { %v970_v61 = vadd.f32 %v3058_v12, %v969_v5  ;;  %1987 = vmatprep.mubr.f32.mxu1 %v1006_v20 }
 0x2c8   : > { %1988 = vmatmul.mubr.f32.gmra.mrb[44].mxu1 %v1007_v3  ;;  %v1009_v32 = vmax.f32 %v975_v41, 0.0 }
 0x2c9   : > { %v1008_v30 = vmax.f32 %v970_v61, 0.0 }
 0x2cb   : > { %1990 = vmatprep.mubr.f32.mxu1 %v1008_v30 }
 0x2cc   : > { %1991 = vmatmul.mubr.f32.gmra.mrb[46].mxu1 %v1009_v32 }
 0x363   : > { %v1947_v34 = vpop.f32.mrb[16].mxu1 }
 0x364   : > { %v1105_v24 = vadd.f32 %v1947_v34, %v3095_v33  ;;  %v1099_v12 = vpop.f32.mrb[17].mxu1 }
 0x365   : > { %v1100_v21 = vadd.f32 %v3095_v33, %v1099_v12 }
 0x366   : > { %v1259_v15 = vmax.f32 %v1105_v24, 0.0 }
 0x367   : > { %v1258_v36 = vmax.f32 %v1100_v21, 0.0  ;;  %v1950_v57 = vpop.f32.mrb[18].mxu1 }
 0x368   : > { %v1115_v37 = vadd.f32 %v1950_v57, %v3095_v33  ;;  %v1109_v7 = vpop.f32.mrb[19].mxu1 }
 0x369   : > { %v1110_v45 = vadd.f32 %v3095_v33, %v1109_v7  ;;  %2025 = vmatprep.mubr.f32.mxu0 %v1258_v36 }
 0x36a   : > { %2026 = vmatmul.mubr.f32.vlgmr.msra.gmra.mrb[16].mxu0 %v1259_v15  ;;  %v1261_v39 = vmax.f32 %v1115_v37, 0.0 }
 0x36b   : > { %v1260_v26 = vmax.f32 %v1110_v45, 0.0  ;;  %v1953_v4 = vpop.f32.mrb[20].mxu1 }
 0x36c   : > { %v1125_v1 = vadd.f32 %v1953_v4, %v3095_v33  ;;  %v1119_v38 = vpop.f32.mrb[21].mxu1 }
 0x36d   : > { %v1120_v40 = vadd.f32 %v3095_v33, %v1119_v38  ;;  %2028 = vmatprep.mubr.f32.mxu0 %v1260_v26 }
 0x36e   : > { %2029 = vmatmul.mubr.f32.gmra.mrb[18].mxu0 %v1261_v39  ;;  %v1263_v23 = vmax.f32 %v1125_v1, 0.0 }
 0x36f   : > { %v1262_v28 = vmax.f32 %v1120_v40, 0.0  ;;  %v1956_v43 = vpop.f32.mrb[22].mxu1 }
 0x370   : > { %v1135_v14 = vadd.f32 %v1956_v43, %v3095_v33  ;;  %v1129_v17 = vpop.f32.mrb[23].mxu1 }
 0x371   : > { %v1130_v42 = vadd.f32 %v3095_v33, %v1129_v17  ;;  %2031 = vmatprep.mubr.f32.mxu0 %v1262_v28 }
 0x372   : > { %2032 = vmatmul.mubr.f32.gmra.mrb[20].mxu0 %v1263_v23  ;;  %v1265_v48 = vmax.f32 %v1135_v14, 0.0 }
 0x373   : > { %v1264_v44 = vmax.f32 %v1130_v42, 0.0  ;;  %v1959_v47 = vpop.f32.mrb[24].mxu1 }
 0x374   : > { %v1145_v6 = vadd.f32 %v1959_v47, %v3095_v33  ;;  %v1139_v52 = vpop.f32.mrb[25].mxu1 }
 0x375   : > { %v1140_v8 = vadd.f32 %v3095_v33, %v1139_v52  ;;  %2034 = vmatprep.mubr.f32.mxu0 %v1264_v44 }
 0x376   : > { %2035 = vmatmul.mubr.f32.gmra.mrb[22].mxu0 %v1265_v48  ;;  %v1267_v46 = vmax.f32 %v1145_v6, 0.0 }
 0x377   : > { %v1266_v25 = vmax.f32 %v1140_v8, 0.0  ;;  %v1962_v56 = vpop.f32.mrb[26].mxu1 }
 0x378   : > { %v1155_v50 = vadd.f32 %v1962_v56, %v3095_v33  ;;  %v1149_v51 = vpop.f32.mrb[27].mxu1 }
 0x379   : > { %v1150_v18 = vadd.f32 %v3095_v33, %v1149_v51  ;;  %2037 = vmatprep.mubr.f32.mxu0 %v1266_v25 }
 0x37a   : > { %2038 = vmatmul.mubr.f32.gmra.mrb[24].mxu0 %v1267_v46  ;;  %v1269_v55 = vmax.f32 %v1155_v50, 0.0 }
 0x37b   : > { %v1268_v54 = vmax.f32 %v1150_v18, 0.0  ;;  %v1965_v16 = vpop.f32.mrb[28].mxu1  ;;  %v3134_v18 = vld [vmem:[%s3224_s6] ss:$0 sm:$0xff] }
 0x37c   : > { %v1165_v9 = vadd.f32 %v1965_v16, %v3095_v33  ;;  %v1159_v27 = vpop.f32.mrb[29].mxu1 }
 0x37d   : > { %v1160_v59 = vadd.f32 %v3095_v33, %v1159_v27  ;;  %2040 = vmatprep.mubr.f32.mxu0 %v1268_v54 }
 0x37e   : > { %2041 = vmatmul.mubr.f32.gmra.mrb[26].mxu0 %v1269_v55  ;;  %v1271_v53 = vmax.f32 %v1165_v9, 0.0 }
 0x37f   : > { %v1270_v10 = vmax.f32 %v1160_v59, 0.0  ;;  %v1968_v19 = vpop.f32.mrb[30].mxu1 }
 0x380   : > { %v1175_v58 = vadd.f32 %v1968_v19, %v3095_v33  ;;  %v1169_v60 = vpop.f32.mrb[31].mxu1 }
 0x381   : > { %v1170_v35 = vadd.f32 %v3095_v33, %v1169_v60  ;;  %2043 = vmatprep.mubr.f32.mxu0 %v1270_v10 }
 0x382   : > { %2044 = vmatmul.mubr.f32.gmra.mrb[28].mxu0 %v1271_v53  ;;  %v1273_v0 = vmax.f32 %v1175_v58, 0.0 }
 0x383   : > { %v1272_v62 = vmax.f32 %v1170_v35, 0.0  ;;  %v1971_v63 = vpop.f32.mrb[32].mxu1 }
 0x384   : > { %v1185_v11 = vadd.f32 %v1971_v63, %v3095_v33  ;;  %v1179_v29 = vpop.f32.mrb[33].mxu1 }
 0x385   : > { %v1180_v2 = vadd.f32 %v3095_v33, %v1179_v29  ;;  %2046 = vmatprep.mubr.f32.mxu0 %v1272_v62 }
 0x386   : > { %2047 = vmatmul.mubr.f32.gmra.mrb[30].mxu0 %v1273_v0  ;;  %v1275_v3 = vmax.f32 %v1185_v11, 0.0 }
 0x387   : > { %v1274_v20 = vmax.f32 %v1180_v2, 0.0  ;;  %v1974_v13 = vpop.f32.mrb[34].mxu1 }
 0x388   : > { %v1195_v41 = vadd.f32 %v1974_v13, %v3095_v33  ;;  %v1189_v5 = vpop.f32.mrb[35].mxu1 }
 0x389   : > { %v1190_v61 = vadd.f32 %v3095_v33, %v1189_v5  ;;  %2049 = vmatprep.mubr.f32.mxu0 %v1274_v20 }
 0x38a   : > { %2050 = vmatmul.mubr.f32.gmra.mrb[32].mxu0 %v1275_v3  ;;  %v1277_v22 = vmax.f32 %v1195_v41, 0.0 }
 0x38b   : > { %v1276_v30 = vmax.f32 %v1190_v61, 0.0  ;;  %v1977_v32 = vpop.f32.mrb[36].mxu1 }
 0x38c   : > { %v1205_v31 = vadd.f32 %v1977_v32, %v3095_v33  ;;  %v1199_v49 = vpop.f32.mrb[37].mxu1 }
 0x38d   : > { %v1200_v34 = vadd.f32 %v3095_v33, %v1199_v49  ;;  %2052 = vmatprep.mubr.f32.mxu0 %v1276_v30 }
 0x38e   : > { %2053 = vmatmul.mubr.f32.gmra.mrb[34].mxu0 %v1277_v22  ;;  %v1279_v21 = vmax.f32 %v1205_v31, 0.0 }
 0x38f   : > { %v1278_v24 = vmax.f32 %v1200_v34, 0.0  ;;  %v1980_v12 = vpop.f32.mrb[38].mxu1 }
 0x390   : > { %v1215_v36 = vadd.f32 %v1980_v12, %v3095_v33  ;;  %v1209_v57 = vpop.f32.mrb[39].mxu1 }
 0x391   : > { %v1210_v15 = vadd.f32 %v3095_v33, %v1209_v57  ;;  %2055 = vmatprep.mubr.f32.mxu0 %v1278_v24 }
 0x392   : > { %2056 = vmatmul.mubr.f32.gmra.mrb[36].mxu0 %v1279_v21  ;;  %v1281_v45 = vmax.f32 %v1215_v36, 0.0 }
 0x393   : > { %v1280_v37 = vmax.f32 %v1210_v15, 0.0  ;;  %v1983_v7 = vpop.f32.mrb[40].mxu1 }
 0x394   : > { %v1225_v26 = vadd.f32 %v1983_v7, %v3095_v33  ;;  %v1219_v4 = vpop.f32.mrb[41].mxu1 }
 0x395   : > { %v1220_v39 = vadd.f32 %v3095_v33, %v1219_v4  ;;  %2058 = vmatprep.mubr.f32.mxu0 %v1280_v37 }
 0x396   : > { %2059 = vmatmul.mubr.f32.gmra.mrb[38].mxu0 %v1281_v45  ;;  %v1283_v40 = vmax.f32 %v1225_v26, 0.0 }
 0x397   : > { %v1282_v1 = vmax.f32 %v1220_v39, 0.0  ;;  %v1986_v38 = vpop.f32.mrb[42].mxu1 }
 0x398   : > { %v1235_v28 = vadd.f32 %v1986_v38, %v3095_v33  ;;  %v1229_v43 = vpop.f32.mrb[43].mxu1 }
 0x399   : > { %v1230_v23 = vadd.f32 %v3095_v33, %v1229_v43  ;;  %2061 = vmatprep.mubr.f32.mxu0 %v1282_v1 }
 0x39a   : > { %2062 = vmatmul.mubr.f32.gmra.mrb[40].mxu0 %v1283_v40  ;;  %v1285_v42 = vmax.f32 %v1235_v28, 0.0 }
 0x39b   : > { %v1284_v14 = vmax.f32 %v1230_v23, 0.0  ;;  %v1989_v17 = vpop.f32.mrb[44].mxu1 }
 0x39c   : > { %v1245_v44 = vadd.f32 %v1989_v17, %v3095_v33  ;;  %v1239_v47 = vpop.f32.mrb[45].mxu1 }
 0x39d   : > { %v1240_v48 = vadd.f32 %v3095_v33, %v1239_v47  ;;  %2064 = vmatprep.mubr.f32.mxu0 %v1284_v14 }
 0x39e   : > { %2065 = vmatmul.mubr.f32.gmra.mrb[42].mxu0 %v1285_v42  ;;  %v1287_v8 = vmax.f32 %v1245_v44, 0.0 }
 0x39f   : > { %v1286_v6 = vmax.f32 %v1240_v48, 0.0  ;;  %v1992_v52 = vpop.f32.mrb[46].mxu1 }
 0x3a0   : > { %v1255_v25 = vadd.f32 %v1992_v52, %v3095_v33  ;;  %v1249_v56 = vpop.f32.mrb[47].mxu1 }
 0x3a1   : > { %v1250_v46 = vadd.f32 %v3095_v33, %v1249_v56  ;;  %2067 = vmatprep.mubr.f32.mxu0 %v1286_v6 }
 0x3a2   : > { %2068 = vmatmul.mubr.f32.gmra.mrb[44].mxu0 %v1287_v8  ;;  %v1289_v51 = vmax.f32 %v1255_v25, 0.0 }
 0x3a3   : > { %v1288_v50 = vmax.f32 %v1250_v46, 0.0 }
 0x3a5   : > { %2070 = vmatprep.mubr.f32.mxu0 %v1288_v50 }
 0x3a6   : > { %2071 = vmatmul.mubr.f32.gmra.mrb[46].mxu0 %v1289_v51 }
 0x43d   : > { %v2027_v33 = vpop.f32.mrb[16].mxu0 }
 0x43e   : > { %v1385_v54 = vadd.f32 %v2027_v33, %v3134_v18  ;;  %v1379_v16 = vpop.f32.mrb[17].mxu0 }
 0x43f   : > { %v1380_v55 = vadd.f32 %v3134_v18, %v1379_v16 }
 0x440   : > { %1539 = vst [vmem:[%s3139_s15 + $0x8] sm:$0xff] %v1385_v54 }
 0x441   : > { %1538 = vst [vmem:[%s3139_s15] sm:$0xff] %v1380_v55  ;;  %v2030_v9 = vpop.f32.mrb[18].mxu0 }
 0x442   : > { %v1395_v27 = vadd.f32 %v2030_v9, %v3134_v18  ;;  %v1389_v59 = vpop.f32.mrb[19].mxu0 }
 0x443   : > { %v1390_v10 = vadd.f32 %v3134_v18, %v1389_v59 }
 0x444   : > { %1541 = vst [vmem:[%s3139_s15 + $0x18] sm:$0xff] %v1395_v27 }
 0x445   : > { %1540 = vst [vmem:[%s3139_s15 + $0x10] sm:$0xff] %v1390_v10  ;;  %v2033_v19 = vpop.f32.mrb[20].mxu0 }
 0x446   : > { %v1405_v53 = vadd.f32 %v2033_v19, %v3134_v18  ;;  %v1399_v58 = vpop.f32.mrb[21].mxu0 }
 0x447   : > { %v1400_v60 = vadd.f32 %v3134_v18, %v1399_v58 }
 0x448   : > { %1543 = vst [vmem:[%s3139_s15 + $0x28] sm:$0xff] %v1405_v53 }
 0x449   : > { %1542 = vst [vmem:[%s3139_s15 + $0x20] sm:$0xff] %v1400_v60  ;;  %v2036_v35 = vpop.f32.mrb[22].mxu0 }
 0x44a   : > { %v1415_v62 = vadd.f32 %v2036_v35, %v3134_v18  ;;  %v1409_v63 = vpop.f32.mrb[23].mxu0 }
 0x44b   : > { %v1410_v0 = vadd.f32 %v3134_v18, %v1409_v63 }
 0x44c   : > { %1545 = vst [vmem:[%s3139_s15 + $0x38] sm:$0xff] %v1415_v62 }
 0x44d   : > { %1544 = vst [vmem:[%s3139_s15 + $0x30] sm:$0xff] %v1410_v0  ;;  %v2039_v11 = vpop.f32.mrb[24].mxu0 }
 0x44e   : > { %v1425_v29 = vadd.f32 %v2039_v11, %v3134_v18  ;;  %v1419_v2 = vpop.f32.mrb[25].mxu0 }
 0x44f   : > { %v1420_v20 = vadd.f32 %v3134_v18, %v1419_v2 }
 0x450   : > { %1547 = vst [vmem:[%s3139_s15 + $0x48] sm:$0xff] %v1425_v29 }
 0x451   : > { %1546 = vst [vmem:[%s3139_s15 + $0x40] sm:$0xff] %v1420_v20  ;;  %v2042_v13 = vpop.f32.mrb[26].mxu0 }
 0x452   : > { %v1435_v3 = vadd.f32 %v2042_v13, %v3134_v18  ;;  %v1429_v41 = vpop.f32.mrb[27].mxu0 }
 0x453   : > { %v1430_v5 = vadd.f32 %v3134_v18, %v1429_v41 }
 0x454   : > { %1549 = vst [vmem:[%s3139_s15 + $0x58] sm:$0xff] %v1435_v3 }
 0x455   : > { %1548 = vst [vmem:[%s3139_s15 + $0x50] sm:$0xff] %v1430_v5  ;;  %v2045_v61 = vpop.f32.mrb[28].mxu0 }
 0x456   : > { %v1445_v30 = vadd.f32 %v2045_v61, %v3134_v18  ;;  %v1439_v32 = vpop.f32.mrb[29].mxu0 }
 0x457   : > { %v1440_v22 = vadd.f32 %v3134_v18, %v1439_v32 }
 0x458   : > { %1551 = vst [vmem:[%s3139_s15 + $0x68] sm:$0xff] %v1445_v30 }
 0x459   : > { %1550 = vst [vmem:[%s3139_s15 + $0x60] sm:$0xff] %v1440_v22  ;;  %v2048_v31 = vpop.f32.mrb[30].mxu0 }
 0x45a   : > { %v1455_v49 = vadd.f32 %v2048_v31, %v3134_v18  ;;  %v1449_v34 = vpop.f32.mrb[31].mxu0 }
 0x45b   : > { %v1450_v24 = vadd.f32 %v3134_v18, %v1449_v34 }
 0x45c   : > { %1553 = vst [vmem:[%s3139_s15 + $0x78] sm:$0xff] %v1455_v49 }
 0x45d   : > { %1552 = vst [vmem:[%s3139_s15 + $0x70] sm:$0xff] %v1450_v24  ;;  %v2051_v12 = vpop.f32.mrb[32].mxu0 }
 0x45e   : > { %v1465_v21 = vadd.f32 %v2051_v12, %v3134_v18  ;;  %v1459_v36 = vpop.f32.mrb[33].mxu0 }
 0x45f   : > { %v1460_v57 = vadd.f32 %v3134_v18, %v1459_v36 }
 0x460   : > { %1555 = vst [vmem:[%s3139_s15 + $0x88] sm:$0xff] %v1465_v21 }
 0x461   : > { %1554 = vst [vmem:[%s3139_s15 + $0x80] sm:$0xff] %v1460_v57  ;;  %v2054_v15 = vpop.f32.mrb[34].mxu0 }
 0x462   : > { %v1475_v37 = vadd.f32 %v2054_v15, %v3134_v18  ;;  %v1469_v7 = vpop.f32.mrb[35].mxu0 }
 0x463   : > { %v1470_v45 = vadd.f32 %v3134_v18, %v1469_v7 }
 0x464   : > { %1557 = vst [vmem:[%s3139_s15 + $0x98] sm:$0xff] %v1475_v37 }
 0x465   : > { %1556 = vst [vmem:[%s3139_s15 + $0x90] sm:$0xff] %v1470_v45  ;;  %v2057_v26 = vpop.f32.mrb[36].mxu0 }
 0x466   : > { %v1485_v4 = vadd.f32 %v2057_v26, %v3134_v18  ;;  %v1479_v39 = vpop.f32.mrb[37].mxu0 }
 0x467   : > { %v1480_v1 = vadd.f32 %v3134_v18, %v1479_v39 }
 0x468   : > { %1559 = vst [vmem:[%s3139_s15 + $0xa8] sm:$0xff] %v1485_v4 }
 0x469   : > { %1558 = vst [vmem:[%s3139_s15 + $0xa0] sm:$0xff] %v1480_v1  ;;  %v2060_v38 = vpop.f32.mrb[38].mxu0 }
 0x46a   : > { %v1495_v40 = vadd.f32 %v2060_v38, %v3134_v18  ;;  %v1489_v28 = vpop.f32.mrb[39].mxu0 }
 0x46b   : > { %v1490_v43 = vadd.f32 %v3134_v18, %v1489_v28 }
 0x46c   : > { %1561 = vst [vmem:[%s3139_s15 + $0xb8] sm:$0xff] %v1495_v40 }
 0x46d   : > { %1560 = vst [vmem:[%s3139_s15 + $0xb0] sm:$0xff] %v1490_v43  ;;  %v2063_v23 = vpop.f32.mrb[40].mxu0 }
 0x46e   : > { %v1505_v14 = vadd.f32 %v2063_v23, %v3134_v18  ;;  %v1499_v17 = vpop.f32.mrb[41].mxu0 }
 0x46f   : > { %v1500_v42 = vadd.f32 %v3134_v18, %v1499_v17 }
 0x470   : > { %1563 = vst [vmem:[%s3139_s15 + $0xc8] sm:$0xff] %v1505_v14 }
 0x471   : > { %1562 = vst [vmem:[%s3139_s15 + $0xc0] sm:$0xff] %v1500_v42  ;;  %v2066_v44 = vpop.f32.mrb[42].mxu0 }
 0x472   : > { %v1515_v47 = vadd.f32 %v2066_v44, %v3134_v18  ;;  %v1509_v48 = vpop.f32.mrb[43].mxu0 }
 0x473   : > { %v1510_v6 = vadd.f32 %v3134_v18, %v1509_v48 }
 0x474   : > { %1565 = vst [vmem:[%s3139_s15 + $0xd8] sm:$0xff] %v1515_v47 }
 0x475   : > { %1564 = vst [vmem:[%s3139_s15 + $0xd0] sm:$0xff] %v1510_v6  ;;  %v2069_v52 = vpop.f32.mrb[44].mxu0 }
 0x476   : > { %v1525_v8 = vadd.f32 %v2069_v52, %v3134_v18  ;;  %v1519_v25 = vpop.f32.mrb[45].mxu0 }
 0x477   : > { %v1520_v56 = vadd.f32 %v3134_v18, %v1519_v25 }
 0x478   : > { %1567 = vst [vmem:[%s3139_s15 + $0xe8] sm:$0xff] %v1525_v8 }
 0x479   : > { %1566 = vst [vmem:[%s3139_s15 + $0xe0] sm:$0xff] %v1520_v56  ;;  %v2072_v46 = vpop.f32.mrb[46].mxu0 }
 0x47a   : > { %v1535_v50 = vadd.f32 %v2072_v46, %v3134_v18  ;;  %v1529_v51 = vpop.f32.mrb[47].mxu0 }
 0x47b   : > { %v1530_v33 = vadd.f32 %v3134_v18, %v1529_v51 }
 0x47c   : > { %1569 = vst [vmem:[%s3139_s15 + $0xf8] sm:$0xff] %v1535_v50 }
 0x47d   : > { %1568 = vst [vmem:[%s3139_s15 + $0xf0] sm:$0xff] %v1530_v33 }
 0x47e PF: > { %p19_p11 = scmp.ge.s32.totalorder %s2658_s21, 4   ;;  %s3239_s24 = smov %s2469_s25 }
 0x47f   : > { %s3240_s25 = smov %s2473_s26  ;;  %s3241_s26 = smov %s2668_s17 }
 0x480   : > { %s3242_s27 = smov %s2658_s21  ;;  %21 = sbr.rel (!%p19_p11) target bundleno = 5 (0x5), region = 100 }
 0x487   :  { %1592 = vsyncpa [#allocation3], 1 }
 0x488   :  { %1594 = vsyncpa [#allocation3 + $0x1], 1 }
 0x489   :  { %1595 = vsyncpa [#allocation5], 1 }
 0x48a   :  { %1596 = vsyncpa [#allocation8], 1 }

</bundles_post_ra>
